<compile_context>
chip_gen: v6e
topology: v6e:2x2x1
jax: 0.10.0
libtpu: 0.0.40
codegen_flags: <defaults>
</compile_context>

<pallas_src>
import functools
import math

import jax
import jax.numpy as jnp
from jax.experimental import pallas as pl
from jax.experimental.pallas import tpu as pltpu


# ----------------------------- in-kernel helpers ---------------------------- #

def _gelu_tanh(x):
    c = math.sqrt(2.0 / math.pi)
    return 0.5 * x * (1.0 + jnp.tanh(c * (x + 0.044715 * x * x * x)))


def _softplus_stable(x):
    # matches PyTorch BCEWithLogits formulation: max(x,0) + log(1 + exp(-|x|))
    return jnp.maximum(x, 0.0) + jnp.log(1.0 + jnp.exp(-jnp.abs(x)))


def _ln(x, g, b, eps=1e-5):
    mean = jnp.mean(x, axis=-1, keepdims=True)
    xc = x - mean
    var = jnp.mean(xc * xc, axis=-1, keepdims=True)
    return xc * jax.lax.rsqrt(var + eps) * g + b


# ------------------------------- fused kernel ------------------------------- #

def _fused_kernel(items_ref, mrow_ref, mcol_ref,
                  fc_w_ref, fc_b_ref, mlp_w_ref, mlp_b_ref,
                  pos_ref, encg_ref, encb_ref,
                  ln1g_ref, ln1b_ref, wqkv_ref, bqkv_ref, wo_ref, bo_ref,
                  ln2g_ref, ln2b_ref, w1_ref, b1_ref, w2_ref, b2_ref,
                  out_ref, *, num_heads):
    Lp1 = items_ref.shape[2]
    L = Lp1 - 1
    D = fc_w_ref.shape[1]
    H = num_heads
    dh = D // H
    n_layers = wqkv_ref.shape[0]
    dnn_layer = mlp_w_ref.shape[0]
    scale = 1.0 / math.sqrt(dh)

    # ---- MLP_Layers (fc + [Dropout(identity), Linear, GELU] x dnn_layer) ----
    def mlp(t):
        h = jnp.dot(t, fc_w_ref[...], preferred_element_type=jnp.float32) + fc_b_ref[...]
        for i in range(dnn_layer):
            h = jnp.dot(h, mlp_w_ref[i], preferred_element_type=jnp.float32) + mlp_b_ref[i]
            h = _gelu_tanh(h)
        return h

    pos_items = mlp(items_ref[0, 0])      # (Lp1, D)  — the "0" slot items
    neg_items = mlp(items_ref[0, 1])      # (Lp1, D)  — the "1" slot items

    input_logs = pos_items[:L]            # (L, D)
    target_pos = pos_items[1:]            # (L, D)
    target_neg = neg_items[:L]            # (L, D)

    # ---- additive attention mask (causal + key padding), built in-kernel ----
    keep_row = mrow_ref[0] != 0.0                                   # (1, L)
    row = jax.lax.broadcasted_iota(jnp.int32, (L, L), 0)
    col = jax.lax.broadcasted_iota(jnp.int32, (L, L), 1)
    att_bias = jnp.where((col <= row) & keep_row, 0.0, -1e9).astype(jnp.float32)

    # ---- User_Encoder: pos-emb + LayerNorm, then pre-norm transformer blocks ----
    out = _ln(input_logs + pos_ref[...], encg_ref[...], encb_ref[...])

    for l in range(n_layers):
        # multi-head self-attention (merged QKV projection)
        xn = _ln(out, ln1g_ref[l], ln1b_ref[l])
        qkv = jnp.dot(xn, wqkv_ref[l], preferred_element_type=jnp.float32) + bqkv_ref[l]
        q = qkv[:, 0:D] * scale
        k = qkv[:, D:2 * D]
        v = qkv[:, 2 * D:3 * D]

        heads = []
        for hh in range(H):
            sl = slice(hh * dh, (hh + 1) * dh)
            s = jax.lax.dot_general(q[:, sl], k[:, sl],
                                    (((1,), (1,)), ((), ())),
                                    preferred_element_type=jnp.float32)   # (L, L)
            s = s + att_bias
            s = s - jnp.max(s, axis=-1, keepdims=True)
            p = jnp.exp(s)
            p = p * pl.reciprocal(jnp.sum(p, axis=-1, keepdims=True), approx=True)
            heads.append(jnp.dot(p, v[:, sl], preferred_element_type=jnp.float32))
        a = jnp.concatenate(heads, axis=-1)                               # (L, D)
        a = jnp.dot(a, wo_ref[l], preferred_element_type=jnp.float32) + bo_ref[l]
        out = out + a

        # feed-forward
        yn = _ln(out, ln2g_ref[l], ln2b_ref[l])
        f = _gelu_tanh(jnp.dot(yn, w1_ref[l], preferred_element_type=jnp.float32) + b1_ref[l])
        f = jnp.dot(f, w2_ref[l], preferred_element_type=jnp.float32) + b2_ref[l]
        out = out + f

    # ---- fused masked BCEWithLogits partial sums for this batch element ----
    pos_score = jnp.sum(out * target_pos, axis=-1, keepdims=True)    # (L, 1)
    neg_score = jnp.sum(out * target_neg, axis=-1, keepdims=True)    # (L, 1)
    m = (mcol_ref[0] != 0.0).astype(jnp.float32)                     # (L, 1)
    per_t = _softplus_stable(-pos_score) + _softplus_stable(neg_score)
    num = jnp.sum(m * per_t, keepdims=True)                          # (1, 1)
    cnt = jnp.sum(m, keepdims=True)                                  # (1, 1)

    lane = jax.lax.broadcasted_iota(jnp.int32, (1, 128), 1)
    out_ref[0] = jnp.where(lane == 0, num, jnp.where(lane == 1, cnt, 0.0))


# ----------------------------- parameter setup ------------------------------ #

def _xavier(key, shape):
    fan_in, fan_out = shape[-2], shape[-1]
    std = math.sqrt(2.0 / (fan_in + fan_out))
    return jax.random.normal(key, shape, jnp.float32) * std


def init_params(key, word_dim, D, L, n_layers, dnn_layer):
    d_ff = 4 * D
    keys = iter(jax.random.split(key, 16))
    p = {}
    p["fc_w"] = _xavier(next(keys), (word_dim, D))
    p["fc_b"] = jnp.zeros((1, D), jnp.float32)
    p["mlp_w"] = _xavier(next(keys), (dnn_layer, D, D))
    p["mlp_b"] = jnp.zeros((dnn_layer, 1, D), jnp.float32)
    p["pos_emb"] = jax.random.normal(next(keys), (L, D), jnp.float32) * 0.02
    p["enc_ln_g"] = jnp.ones((1, D), jnp.float32)
    p["enc_ln_b"] = jnp.zeros((1, D), jnp.float32)
    p["ln1_g"] = jnp.ones((n_layers, 1, D), jnp.float32)
    p["ln1_b"] = jnp.zeros((n_layers, 1, D), jnp.float32)
    p["wqkv"] = _xavier(next(keys), (n_layers, D, 3 * D))     # merged Wq|Wk|Wv
    p["bqkv"] = jnp.zeros((n_layers, 1, 3 * D), jnp.float32)
    p["wo"] = _xavier(next(keys), (n_layers, D, D))
    p["bo"] = jnp.zeros((n_layers, 1, D), jnp.float32)
    p["ln2_g"] = jnp.ones((n_layers, 1, D), jnp.float32)
    p["ln2_b"] = jnp.zeros((n_layers, 1, D), jnp.float32)
    p["w1"] = _xavier(next(keys), (n_layers, D, d_ff))
    p["b1"] = jnp.zeros((n_layers, 1, d_ff), jnp.float32)
    p["w2"] = _xavier(next(keys), (n_layers, d_ff, D))
    p["b2"] = jnp.zeros((n_layers, 1, D), jnp.float32)
    return p


# ------------------------------ model forward ------------------------------- #

def model_forward(params, sample_items, log_mask, B, Lp1, D, H):
    L = Lp1 - 1
    W = sample_items.shape[-1]
    n_layers = params["wqkv"].shape[0]
    dnn_layer = params["mlp_w"].shape[0]
    d_ff = params["w1"].shape[-1]

    # layout plumbing (wrapper-side): (B*Lp1*2, W) -> (B, 2, Lp1, W) so pos/neg
    # item rows are contiguous per batch element; log_mask in row & column layouts.
    items = sample_items.reshape(B, Lp1, 2, W).transpose(0, 2, 1, 3)
    lm = log_mask.astype(jnp.float32)
    mask_row = lm.reshape(B, 1, L)
    mask_col = lm.reshape(B, L, 1)

    full2 = lambda shape: pl.BlockSpec(shape, lambda b: (0, 0))
    full3 = lambda shape: pl.BlockSpec(shape, lambda b: (0, 0, 0))

    in_specs = [
        pl.BlockSpec((1, 2, Lp1, W), lambda b: (b, 0, 0, 0)),   # items
        pl.BlockSpec((1, 1, L), lambda b: (b, 0, 0)),           # mask (row layout)
        pl.BlockSpec((1, L, 1), lambda b: (b, 0, 0)),           # mask (col layout)
        full2((W, D)), full2((1, D)),                           # fc
        full3((dnn_layer, D, D)), full3((dnn_layer, 1, D)),     # dnn layers
        full2((L, D)), full2((1, D)), full2((1, D)),            # pos_emb, enc LN
        full3((n_layers, 1, D)), full3((n_layers, 1, D)),       # ln1
        full3((n_layers, D, 3 * D)), full3((n_layers, 1, 3 * D)),  # qkv
        full3((n_layers, D, D)), full3((n_layers, 1, D)),       # out proj
        full3((n_layers, 1, D)), full3((n_layers, 1, D)),       # ln2
        full3((n_layers, D, d_ff)), full3((n_layers, 1, d_ff)),  # ffn w1
        full3((n_layers, d_ff, D)), full3((n_layers, 1, D)),    # ffn w2
    ]

    partials = pl.pallas_call(
        functools.partial(_fused_kernel, num_heads=H),
        out_shape=jax.ShapeDtypeStruct((B, 1, 128), jnp.float32),
        grid=(B,),
        in_specs=in_specs,
        out_specs=pl.BlockSpec((1, 1, 128), lambda b: (b, 0, 0)),
        compiler_params=pltpu.CompilerParams(
            dimension_semantics=("parallel",)),
    )(items, mask_row, mask_col,
      params["fc_w"], params["fc_b"], params["mlp_w"], params["mlp_b"],
      params["pos_emb"], params["enc_ln_g"], params["enc_ln_b"],
      params["ln1_g"], params["ln1_b"], params["wqkv"], params["bqkv"],
      params["wo"], params["bo"], params["ln2_g"], params["ln2_b"],
      params["w1"], params["b1"], params["w2"], params["b2"])

    # tiny scalar epilogue: loss = mean(BCE pos) + mean(BCE neg) over masked entries
    num = jnp.sum(partials[:, 0, 0])
    cnt = jnp.sum(partials[:, 0, 1])
    return num / cnt


# ---------------------------------- main ------------------------------------ #

if __name__ == "__main__":
    B = 2                  # batch
    max_seq_len = 8        # args.max_seq_len
    Lp1 = max_seq_len + 1  # self.max_seq_len inside the module
    word_dim = 64          # args.word_embedding_dim
    D = 32                 # args.embedding_dim
    H = 2                  # args.num_attention_heads
    n_layers = 2           # args.transformer_block
    dnn_layer = 1          # args.dnn_layer

    key = jax.random.PRNGKey(0)
    k_params, k_items = jax.random.split(key)
    params = init_params(k_params, word_dim, D, max_seq_len, n_layers, dnn_layer)

    # sample_items: (B * (max_seq_len+1) * 2, word_dim) pre-computed text features
    sample_items = jax.random.normal(k_items, (B * Lp1 * 2, word_dim), jnp.float32)

    # log_mask: left-padded sequences (zeros = padding)
    pos_idx = jnp.arange(max_seq_len)
    pad_len = jnp.array([3, 0])
    log_mask = (pos_idx[None, :] >= pad_len[:, None]).astype(jnp.float32)   # (B, L)

    loss = model_forward(params, sample_items, log_mask, B, Lp1, D, H)
    loss = jax.block_until_ready(loss)
    assert bool(jnp.isfinite(loss))
    print("KERNEL_OK")
</pallas_src>

<mosaic_0001>
module attributes {stable_mosaic.version = 11 : i64} {
  func.func @_fused_kernel(%arg0: i32, %arg1: memref<1x2x9x64xf32, #tpu.memory_space<vmem>>, %arg2: memref<1x1x8xf32, #tpu.memory_space<vmem>>, %arg3: memref<1x8x1xf32, #tpu.memory_space<vmem>>, %arg4: memref<64x32xf32, #tpu.memory_space<vmem>>, %arg5: memref<1x32xf32, #tpu.memory_space<vmem>>, %arg6: memref<1x32x32xf32, #tpu.memory_space<vmem>>, %arg7: memref<1x1x32xf32, #tpu.memory_space<vmem>>, %arg8: memref<8x32xf32, #tpu.memory_space<vmem>>, %arg9: memref<1x32xf32, #tpu.memory_space<vmem>>, %arg10: memref<1x32xf32, #tpu.memory_space<vmem>>, %arg11: memref<2x1x32xf32, #tpu.memory_space<vmem>>, %arg12: memref<2x1x32xf32, #tpu.memory_space<vmem>>, %arg13: memref<2x32x96xf32, #tpu.memory_space<vmem>>, %arg14: memref<2x1x96xf32, #tpu.memory_space<vmem>>, %arg15: memref<2x32x32xf32, #tpu.memory_space<vmem>>, %arg16: memref<2x1x32xf32, #tpu.memory_space<vmem>>, %arg17: memref<2x1x32xf32, #tpu.memory_space<vmem>>, %arg18: memref<2x1x32xf32, #tpu.memory_space<vmem>>, %arg19: memref<2x32x128xf32, #tpu.memory_space<vmem>>, %arg20: memref<2x1x128xf32, #tpu.memory_space<vmem>>, %arg21: memref<2x128x32xf32, #tpu.memory_space<vmem>>, %arg22: memref<2x1x32xf32, #tpu.memory_space<vmem>>, %arg23: memref<1x1x128xf32, #tpu.memory_space<vmem>>) attributes {dimension_semantics = [#tpu.dimension_semantics<parallel>], iteration_bounds = array<i64: 2>, scalar_prefetch = 0 : i64, scratch_operands = 0 : i64, tpu.core_type = #tpu.core_type<tc>, window_params = [{transform_indices = @transform_0, window_bounds = array<i64: 1, 2, 9, 64>}, {transform_indices = @transform_1, window_bounds = array<i64: 1, 1, 8>}, {transform_indices = @transform_2, window_bounds = array<i64: 1, 8, 1>}, {pipeline_mode = #tpu.pipeline_mode<synchronous>, transform_indices = @transform_3, window_bounds = array<i64: 64, 32>}, {pipeline_mode = #tpu.pipeline_mode<synchronous>, transform_indices = @transform_4, window_bounds = array<i64: 1, 32>}, {pipeline_mode = #tpu.pipeline_mode<synchronous>, transform_indices = @transform_5, window_bounds = array<i64: 1, 32, 32>}, {pipeline_mode = #tpu.pipeline_mode<synchronous>, transform_indices = @transform_6, window_bounds = array<i64: 1, 1, 32>}, {pipeline_mode = #tpu.pipeline_mode<synchronous>, transform_indices = @transform_7, window_bounds = array<i64: 8, 32>}, {pipeline_mode = #tpu.pipeline_mode<synchronous>, transform_indices = @transform_8, window_bounds = array<i64: 1, 32>}, {pipeline_mode = #tpu.pipeline_mode<synchronous>, transform_indices = @transform_9, window_bounds = array<i64: 1, 32>}, {pipeline_mode = #tpu.pipeline_mode<synchronous>, transform_indices = @transform_10, window_bounds = array<i64: 2, 1, 32>}, {pipeline_mode = #tpu.pipeline_mode<synchronous>, transform_indices = @transform_11, window_bounds = array<i64: 2, 1, 32>}, {pipeline_mode = #tpu.pipeline_mode<synchronous>, transform_indices = @transform_12, window_bounds = array<i64: 2, 32, 96>}, {pipeline_mode = #tpu.pipeline_mode<synchronous>, transform_indices = @transform_13, window_bounds = array<i64: 2, 1, 96>}, {pipeline_mode = #tpu.pipeline_mode<synchronous>, transform_indices = @transform_14, window_bounds = array<i64: 2, 32, 32>}, {pipeline_mode = #tpu.pipeline_mode<synchronous>, transform_indices = @transform_15, window_bounds = array<i64: 2, 1, 32>}, {pipeline_mode = #tpu.pipeline_mode<synchronous>, transform_indices = @transform_16, window_bounds = array<i64: 2, 1, 32>}, {pipeline_mode = #tpu.pipeline_mode<synchronous>, transform_indices = @transform_17, window_bounds = array<i64: 2, 1, 32>}, {pipeline_mode = #tpu.pipeline_mode<synchronous>, transform_indices = @transform_18, window_bounds = array<i64: 2, 32, 128>}, {pipeline_mode = #tpu.pipeline_mode<synchronous>, transform_indices = @transform_19, window_bounds = array<i64: 2, 1, 128>}, {pipeline_mode = #tpu.pipeline_mode<synchronous>, transform_indices = @transform_20, window_bounds = array<i64: 2, 128, 32>}, {pipeline_mode = #tpu.pipeline_mode<synchronous>, transform_indices = @transform_21, window_bounds = array<i64: 2, 1, 32>}, {transform_indices = @transform_22, window_bounds = array<i64: 1, 1, 128>}]} {
    %c0 = arith.constant 0 : index
    %c0_0 = arith.constant 0 : index
    %c0_1 = arith.constant 0 : index
    %c0_2 = arith.constant 0 : index
    %0 = vector.load %arg1[%c0, %c0_0, %c0_1, %c0_2] : memref<1x2x9x64xf32, #tpu.memory_space<vmem>>, vector<1x1x9x64xf32>
    %1 = vector.shape_cast %0 : vector<1x1x9x64xf32> to vector<9x64xf32>
    %c0_3 = arith.constant 0 : index
    %c0_4 = arith.constant 0 : index
    %2 = vector.load %arg4[%c0_3, %c0_4] : memref<64x32xf32, #tpu.memory_space<vmem>>, vector<64x32xf32>
    %cst = arith.constant dense<0.000000e+00> : vector<9x32xf32>
    %3 = tpu.matmul %1, %2, %cst {dimension_numbers = #tpu.dot_dimension_numbers<[1], [0], [0], [1], [0, 0, 1, 1], [], []>} : vector<9x64xf32>, vector<64x32xf32>, vector<9x32xf32> -> vector<9x32xf32>
    %c0_5 = arith.constant 0 : index
    %c0_6 = arith.constant 0 : index
    %4 = vector.load %arg5[%c0_5, %c0_6] : memref<1x32xf32, #tpu.memory_space<vmem>>, vector<1x32xf32>
    %5 = vector.broadcast %4 : vector<1x32xf32> to vector<9x32xf32>
    %6 = arith.addf %3, %5 : vector<9x32xf32>
    %c0_7 = arith.constant 0 : index
    %c0_8 = arith.constant 0 : index
    %c0_9 = arith.constant 0 : index
    %7 = vector.load %arg6[%c0_7, %c0_8, %c0_9] : memref<1x32x32xf32, #tpu.memory_space<vmem>>, vector<1x32x32xf32>
    %8 = vector.shape_cast %7 : vector<1x32x32xf32> to vector<32x32xf32>
    %cst_10 = arith.constant dense<0.000000e+00> : vector<9x32xf32>
    %9 = tpu.matmul %6, %8, %cst_10 {dimension_numbers = #tpu.dot_dimension_numbers<[1], [0], [0], [1], [0, 0, 1, 1], [], []>} : vector<9x32xf32>, vector<32x32xf32>, vector<9x32xf32> -> vector<9x32xf32>
    %c0_11 = arith.constant 0 : index
    %c0_12 = arith.constant 0 : index
    %c0_13 = arith.constant 0 : index
    %10 = vector.load %arg7[%c0_11, %c0_12, %c0_13] : memref<1x1x32xf32, #tpu.memory_space<vmem>>, vector<1x1x32xf32>
    %11 = vector.shape_cast %10 : vector<1x1x32xf32> to vector<1x32xf32>
    %12 = vector.broadcast %11 : vector<1x32xf32> to vector<9x32xf32>
    %13 = arith.addf %9, %12 : vector<9x32xf32>
    %cst_14 = arith.constant 5.000000e-01 : f32
    %14 = vector.broadcast %cst_14 : f32 to vector<9x32xf32>
    %15 = arith.mulf %14, %13 : vector<9x32xf32>
    %cst_15 = arith.constant 4.471500e-02 : f32
    %16 = vector.broadcast %cst_15 : f32 to vector<9x32xf32>
    %17 = arith.mulf %16, %13 : vector<9x32xf32>
    %18 = arith.mulf %17, %13 : vector<9x32xf32>
    %19 = arith.mulf %18, %13 : vector<9x32xf32>
    %20 = arith.addf %13, %19 : vector<9x32xf32>
    %cst_16 = arith.constant 0.797884583 : f32
    %21 = vector.broadcast %cst_16 : f32 to vector<9x32xf32>
    %22 = arith.mulf %21, %20 : vector<9x32xf32>
    %23 = math.tanh %22 : vector<9x32xf32>
    %cst_17 = arith.constant 1.000000e+00 : f32
    %24 = vector.broadcast %cst_17 : f32 to vector<9x32xf32>
    %25 = arith.addf %24, %23 : vector<9x32xf32>
    %26 = arith.mulf %15, %25 : vector<9x32xf32>
    %c0_18 = arith.constant 0 : index
    %c1 = arith.constant 1 : index
    %c0_19 = arith.constant 0 : index
    %c0_20 = arith.constant 0 : index
    %27 = vector.load %arg1[%c0_18, %c1, %c0_19, %c0_20] : memref<1x2x9x64xf32, #tpu.memory_space<vmem>>, vector<1x1x9x64xf32>
    %28 = vector.shape_cast %27 : vector<1x1x9x64xf32> to vector<9x64xf32>
    %c0_21 = arith.constant 0 : index
    %c0_22 = arith.constant 0 : index
    %29 = vector.load %arg4[%c0_21, %c0_22] : memref<64x32xf32, #tpu.memory_space<vmem>>, vector<64x32xf32>
    %cst_23 = arith.constant dense<0.000000e+00> : vector<9x32xf32>
    %30 = tpu.matmul %28, %29, %cst_23 {dimension_numbers = #tpu.dot_dimension_numbers<[1], [0], [0], [1], [0, 0, 1, 1], [], []>} : vector<9x64xf32>, vector<64x32xf32>, vector<9x32xf32> -> vector<9x32xf32>
    %c0_24 = arith.constant 0 : index
    %c0_25 = arith.constant 0 : index
    %31 = vector.load %arg5[%c0_24, %c0_25] : memref<1x32xf32, #tpu.memory_space<vmem>>, vector<1x32xf32>
    %32 = vector.broadcast %31 : vector<1x32xf32> to vector<9x32xf32>
    %33 = arith.addf %30, %32 : vector<9x32xf32>
    %c0_26 = arith.constant 0 : index
    %c0_27 = arith.constant 0 : index
    %c0_28 = arith.constant 0 : index
    %34 = vector.load %arg6[%c0_26, %c0_27, %c0_28] : memref<1x32x32xf32, #tpu.memory_space<vmem>>, vector<1x32x32xf32>
    %35 = vector.shape_cast %34 : vector<1x32x32xf32> to vector<32x32xf32>
    %cst_29 = arith.constant dense<0.000000e+00> : vector<9x32xf32>
    %36 = tpu.matmul %33, %35, %cst_29 {dimension_numbers = #tpu.dot_dimension_numbers<[1], [0], [0], [1], [0, 0, 1, 1], [], []>} : vector<9x32xf32>, vector<32x32xf32>, vector<9x32xf32> -> vector<9x32xf32>
    %c0_30 = arith.constant 0 : index
    %c0_31 = arith.constant 0 : index
    %c0_32 = arith.constant 0 : index
    %37 = vector.load %arg7[%c0_30, %c0_31, %c0_32] : memref<1x1x32xf32, #tpu.memory_space<vmem>>, vector<1x1x32xf32>
    %38 = vector.shape_cast %37 : vector<1x1x32xf32> to vector<1x32xf32>
    %39 = vector.broadcast %38 : vector<1x32xf32> to vector<9x32xf32>
    %40 = arith.addf %36, %39 : vector<9x32xf32>
    %cst_33 = arith.constant 5.000000e-01 : f32
    %41 = vector.broadcast %cst_33 : f32 to vector<9x32xf32>
    %42 = arith.mulf %41, %40 : vector<9x32xf32>
    %cst_34 = arith.constant 4.471500e-02 : f32
    %43 = vector.broadcast %cst_34 : f32 to vector<9x32xf32>
    %44 = arith.mulf %43, %40 : vector<9x32xf32>
    %45 = arith.mulf %44, %40 : vector<9x32xf32>
    %46 = arith.mulf %45, %40 : vector<9x32xf32>
    %47 = arith.addf %40, %46 : vector<9x32xf32>
    %cst_35 = arith.constant 0.797884583 : f32
    %48 = vector.broadcast %cst_35 : f32 to vector<9x32xf32>
    %49 = arith.mulf %48, %47 : vector<9x32xf32>
    %50 = math.tanh %49 : vector<9x32xf32>
    %cst_36 = arith.constant 1.000000e+00 : f32
    %51 = vector.broadcast %cst_36 : f32 to vector<9x32xf32>
    %52 = arith.addf %51, %50 : vector<9x32xf32>
    %53 = arith.mulf %42, %52 : vector<9x32xf32>
    %54 = vector.extract_strided_slice %26 {offsets = [0, 0], sizes = [8, 32], strides = [1, 1]} : vector<9x32xf32> to vector<8x32xf32>
    %55 = vector.extract_strided_slice %26 {offsets = [1, 0], sizes = [8, 32], strides = [1, 1]} : vector<9x32xf32> to vector<8x32xf32>
    %56 = vector.extract_strided_slice %53 {offsets = [0, 0], sizes = [8, 32], strides = [1, 1]} : vector<9x32xf32> to vector<8x32xf32>
    %c0_37 = arith.constant 0 : index
    %c0_38 = arith.constant 0 : index
    %c0_39 = arith.constant 0 : index
    %57 = vector.load %arg2[%c0_37, %c0_38, %c0_39] : memref<1x1x8xf32, #tpu.memory_space<vmem>>, vector<1x1x8xf32>
    %58 = vector.shape_cast %57 : vector<1x1x8xf32> to vector<1x8xf32>
    %cst_40 = arith.constant 0.000000e+00 : f32
    %59 = vector.broadcast %cst_40 : f32 to vector<1x8xf32>
    %60 = arith.cmpf one, %58, %59 : vector<1x8xf32>
    %61 = tpu.iota {dimensions = array<i32: 0>} : vector<8x8xi32>
    %62 = tpu.iota {dimensions = array<i32: 1>} : vector<8x8xi32>
    %63 = arith.cmpi sle, %62, %61 : vector<8x8xi32>
    %64 = vector.broadcast %60 : vector<1x8xi1> to vector<8x8xi1>
    %65 = arith.andi %63, %64 : vector<8x8xi1>
    %cst_41 = arith.constant 0.000000e+00 : f32
    %cst_42 = arith.constant -1.000000e+09 : f32
    %66 = vector.broadcast %cst_41 : f32 to vector<8x8xf32>
    %67 = vector.broadcast %cst_42 : f32 to vector<8x8xf32>
    %68 = arith.select %65, %66, %67 : vector<8x8xi1>, vector<8x8xf32>
    %c0_43 = arith.constant 0 : index
    %c0_44 = arith.constant 0 : index
    %69 = vector.load %arg8[%c0_43, %c0_44] : memref<8x32xf32, #tpu.memory_space<vmem>>, vector<8x32xf32>
    %70 = arith.addf %54, %69 : vector<8x32xf32>
    %c0_45 = arith.constant 0 : index
    %c0_46 = arith.constant 0 : index
    %71 = vector.load %arg9[%c0_45, %c0_46] : memref<1x32xf32, #tpu.memory_space<vmem>>, vector<1x32xf32>
    %c0_47 = arith.constant 0 : index
    %c0_48 = arith.constant 0 : index
    %72 = vector.load %arg10[%c0_47, %c0_48] : memref<1x32xf32, #tpu.memory_space<vmem>>, vector<1x32xf32>
    %cst_49 = arith.constant dense<0.000000e+00> : vector<8xf32>
    %73 = vector.multi_reduction <add>, %70, %cst_49 [1] : vector<8x32xf32> to vector<8xf32>
    %74 = vector.shape_cast %73 : vector<8xf32> to vector<8x1xf32>
    %cst_50 = arith.constant 3.200000e+01 : f32
    %75 = vector.broadcast %cst_50 : f32 to vector<8x1xf32>
    %76 = arith.divf %74, %75 : vector<8x1xf32>
    %77 = vector.broadcast %76 : vector<8x1xf32> to vector<8x32xf32>
    %78 = arith.subf %70, %77 : vector<8x32xf32>
    %79 = arith.mulf %78, %78 : vector<8x32xf32>
    %cst_51 = arith.constant dense<0.000000e+00> : vector<8xf32>
    %80 = vector.multi_reduction <add>, %79, %cst_51 [1] : vector<8x32xf32> to vector<8xf32>
    %81 = vector.shape_cast %80 : vector<8xf32> to vector<8x1xf32>
    %cst_52 = arith.constant 3.200000e+01 : f32
    %82 = vector.broadcast %cst_52 : f32 to vector<8x1xf32>
    %83 = arith.divf %81, %82 : vector<8x1xf32>
    %cst_53 = arith.constant 9.99999974E-6 : f32
    %84 = vector.broadcast %cst_53 : f32 to vector<8x1xf32>
    %85 = arith.addf %83, %84 : vector<8x1xf32>
    %86 = math.rsqrt %85 : vector<8x1xf32>
    %87 = vector.broadcast %86 : vector<8x1xf32> to vector<8x32xf32>
    %88 = arith.mulf %78, %87 : vector<8x32xf32>
    %89 = vector.broadcast %71 : vector<1x32xf32> to vector<8x32xf32>
    %90 = arith.mulf %88, %89 : vector<8x32xf32>
    %91 = vector.broadcast %72 : vector<1x32xf32> to vector<8x32xf32>
    %92 = arith.addf %90, %91 : vector<8x32xf32>
    %c0_54 = arith.constant 0 : index
    %c0_55 = arith.constant 0 : index
    %c0_56 = arith.constant 0 : index
    %93 = vector.load %arg11[%c0_54, %c0_55, %c0_56] : memref<2x1x32xf32, #tpu.memory_space<vmem>>, vector<1x1x32xf32>
    %94 = vector.shape_cast %93 : vector<1x1x32xf32> to vector<1x32xf32>
    %c0_57 = arith.constant 0 : index
    %c0_58 = arith.constant 0 : index
    %c0_59 = arith.constant 0 : index
    %95 = vector.load %arg12[%c0_57, %c0_58, %c0_59] : memref<2x1x32xf32, #tpu.memory_space<vmem>>, vector<1x1x32xf32>
    %96 = vector.shape_cast %95 : vector<1x1x32xf32> to vector<1x32xf32>
    %cst_60 = arith.constant dense<0.000000e+00> : vector<8xf32>
    %97 = vector.multi_reduction <add>, %92, %cst_60 [1] : vector<8x32xf32> to vector<8xf32>
    %98 = vector.shape_cast %97 : vector<8xf32> to vector<8x1xf32>
    %cst_61 = arith.constant 3.200000e+01 : f32
    %99 = vector.broadcast %cst_61 : f32 to vector<8x1xf32>
    %100 = arith.divf %98, %99 : vector<8x1xf32>
    %101 = vector.broadcast %100 : vector<8x1xf32> to vector<8x32xf32>
    %102 = arith.subf %92, %101 : vector<8x32xf32>
    %103 = arith.mulf %102, %102 : vector<8x32xf32>
    %cst_62 = arith.constant dense<0.000000e+00> : vector<8xf32>
    %104 = vector.multi_reduction <add>, %103, %cst_62 [1] : vector<8x32xf32> to vector<8xf32>
    %105 = vector.shape_cast %104 : vector<8xf32> to vector<8x1xf32>
    %cst_63 = arith.constant 3.200000e+01 : f32
    %106 = vector.broadcast %cst_63 : f32 to vector<8x1xf32>
    %107 = arith.divf %105, %106 : vector<8x1xf32>
    %cst_64 = arith.constant 9.99999974E-6 : f32
    %108 = vector.broadcast %cst_64 : f32 to vector<8x1xf32>
    %109 = arith.addf %107, %108 : vector<8x1xf32>
    %110 = math.rsqrt %109 : vector<8x1xf32>
    %111 = vector.broadcast %110 : vector<8x1xf32> to vector<8x32xf32>
    %112 = arith.mulf %102, %111 : vector<8x32xf32>
    %113 = vector.broadcast %94 : vector<1x32xf32> to vector<8x32xf32>
    %114 = arith.mulf %112, %113 : vector<8x32xf32>
    %115 = vector.broadcast %96 : vector<1x32xf32> to vector<8x32xf32>
    %116 = arith.addf %114, %115 : vector<8x32xf32>
    %c0_65 = arith.constant 0 : index
    %c0_66 = arith.constant 0 : index
    %c0_67 = arith.constant 0 : index
    %117 = vector.load %arg13[%c0_65, %c0_66, %c0_67] : memref<2x32x96xf32, #tpu.memory_space<vmem>>, vector<1x32x96xf32>
    %118 = vector.shape_cast %117 : vector<1x32x96xf32> to vector<32x96xf32>
    %cst_68 = arith.constant dense<0.000000e+00> : vector<8x96xf32>
    %119 = tpu.matmul %116, %118, %cst_68 {dimension_numbers = #tpu.dot_dimension_numbers<[1], [0], [0], [1], [0, 0, 1, 1], [], []>} : vector<8x32xf32>, vector<32x96xf32>, vector<8x96xf32> -> vector<8x96xf32>
    %c0_69 = arith.constant 0 : index
    %c0_70 = arith.constant 0 : index
    %c0_71 = arith.constant 0 : index
    %120 = vector.load %arg14[%c0_69, %c0_70, %c0_71] : memref<2x1x96xf32, #tpu.memory_space<vmem>>, vector<1x1x96xf32>
    %121 = vector.shape_cast %120 : vector<1x1x96xf32> to vector<1x96xf32>
    %122 = vector.broadcast %121 : vector<1x96xf32> to vector<8x96xf32>
    %123 = arith.addf %119, %122 : vector<8x96xf32>
    %124 = vector.extract_strided_slice %123 {offsets = [0, 0], sizes = [8, 32], strides = [1, 1]} : vector<8x96xf32> to vector<8x32xf32>
    %cst_72 = arith.constant 2.500000e-01 : f32
    %125 = vector.broadcast %cst_72 : f32 to vector<8x32xf32>
    %126 = arith.mulf %124, %125 : vector<8x32xf32>
    %127 = vector.extract_strided_slice %123 {offsets = [0, 32], sizes = [8, 32], strides = [1, 1]} : vector<8x96xf32> to vector<8x32xf32>
    %128 = vector.extract_strided_slice %123 {offsets = [0, 64], sizes = [8, 32], strides = [1, 1]} : vector<8x96xf32> to vector<8x32xf32>
    %129 = vector.extract_strided_slice %126 {offsets = [0, 0], sizes = [8, 16], strides = [1, 1]} : vector<8x32xf32> to vector<8x16xf32>
    %130 = vector.extract_strided_slice %127 {offsets = [0, 0], sizes = [8, 16], strides = [1, 1]} : vector<8x32xf32> to vector<8x16xf32>
    %cst_73 = arith.constant dense<0.000000e+00> : vector<8x8xf32>
    %131 = tpu.matmul %129, %130, %cst_73 {dimension_numbers = #tpu.dot_dimension_numbers<[1], [1], [0], [0], [0, 0, 1, 0], [], []>} : vector<8x16xf32>, vector<8x16xf32>, vector<8x8xf32> -> vector<8x8xf32>
    %132 = arith.addf %131, %68 : vector<8x8xf32>
    %cst_74 = arith.constant dense<0xFF800000> : vector<8xf32>
    %133 = vector.multi_reduction <maximumf>, %132, %cst_74 [1] : vector<8x8xf32> to vector<8xf32>
    %134 = vector.shape_cast %133 : vector<8xf32> to vector<8x1xf32>
    %135 = vector.broadcast %134 : vector<8x1xf32> to vector<8x8xf32>
    %136 = arith.subf %132, %135 : vector<8x8xf32>
    %137 = math.exp %136 : vector<8x8xf32>
    %cst_75 = arith.constant dense<0.000000e+00> : vector<8xf32>
    %138 = vector.multi_reduction <add>, %137, %cst_75 [1] : vector<8x8xf32> to vector<8xf32>
    %139 = vector.shape_cast %138 : vector<8xf32> to vector<8x1xf32>
    %140 = tpu.reciprocal %139 {approx = true} : vector<8x1xf32> -> vector<8x1xf32>
    %141 = vector.broadcast %140 : vector<8x1xf32> to vector<8x8xf32>
    %142 = arith.mulf %137, %141 : vector<8x8xf32>
    %143 = vector.extract_strided_slice %128 {offsets = [0, 0], sizes = [8, 16], strides = [1, 1]} : vector<8x32xf32> to vector<8x16xf32>
    %cst_76 = arith.constant dense<0.000000e+00> : vector<8x16xf32>
    %144 = tpu.matmul %142, %143, %cst_76 {dimension_numbers = #tpu.dot_dimension_numbers<[1], [0], [0], [1], [0, 0, 1, 1], [], []>} : vector<8x8xf32>, vector<8x16xf32>, vector<8x16xf32> -> vector<8x16xf32>
    %145 = vector.extract_strided_slice %126 {offsets = [0, 16], sizes = [8, 16], strides = [1, 1]} : vector<8x32xf32> to vector<8x16xf32>
    %146 = vector.extract_strided_slice %127 {offsets = [0, 16], sizes = [8, 16], strides = [1, 1]} : vector<8x32xf32> to vector<8x16xf32>
    %cst_77 = arith.constant dense<0.000000e+00> : vector<8x8xf32>
    %147 = tpu.matmul %145, %146, %cst_77 {dimension_numbers = #tpu.dot_dimension_numbers<[1], [1], [0], [0], [0, 0, 1, 0], [], []>} : vector<8x16xf32>, vector<8x16xf32>, vector<8x8xf32> -> vector<8x8xf32>
    %148 = arith.addf %147, %68 : vector<8x8xf32>
    %cst_78 = arith.constant dense<0xFF800000> : vector<8xf32>
    %149 = vector.multi_reduction <maximumf>, %148, %cst_78 [1] : vector<8x8xf32> to vector<8xf32>
    %150 = vector.shape_cast %149 : vector<8xf32> to vector<8x1xf32>
    %151 = vector.broadcast %150 : vector<8x1xf32> to vector<8x8xf32>
    %152 = arith.subf %148, %151 : vector<8x8xf32>
    %153 = math.exp %152 : vector<8x8xf32>
    %cst_79 = arith.constant dense<0.000000e+00> : vector<8xf32>
    %154 = vector.multi_reduction <add>, %153, %cst_79 [1] : vector<8x8xf32> to vector<8xf32>
    %155 = vector.shape_cast %154 : vector<8xf32> to vector<8x1xf32>
    %156 = tpu.reciprocal %155 {approx = true} : vector<8x1xf32> -> vector<8x1xf32>
    %157 = vector.broadcast %156 : vector<8x1xf32> to vector<8x8xf32>
    %158 = arith.mulf %153, %157 : vector<8x8xf32>
    %159 = vector.extract_strided_slice %128 {offsets = [0, 16], sizes = [8, 16], strides = [1, 1]} : vector<8x32xf32> to vector<8x16xf32>
    %cst_80 = arith.constant dense<0.000000e+00> : vector<8x16xf32>
    %160 = tpu.matmul %158, %159, %cst_80 {dimension_numbers = #tpu.dot_dimension_numbers<[1], [0], [0], [1], [0, 0, 1, 1], [], []>} : vector<8x8xf32>, vector<8x16xf32>, vector<8x16xf32> -> vector<8x16xf32>
    %161 = tpu.concatenate %144, %160 in 1 : vector<8x16xf32>, vector<8x16xf32> -> vector<8x32xf32>
    %c0_81 = arith.constant 0 : index
    %c0_82 = arith.constant 0 : index
    %c0_83 = arith.constant 0 : index
    %162 = vector.load %arg15[%c0_81, %c0_82, %c0_83] : memref<2x32x32xf32, #tpu.memory_space<vmem>>, vector<1x32x32xf32>
    %163 = vector.shape_cast %162 : vector<1x32x32xf32> to vector<32x32xf32>
    %cst_84 = arith.constant dense<0.000000e+00> : vector<8x32xf32>
    %164 = tpu.matmul %161, %163, %cst_84 {dimension_numbers = #tpu.dot_dimension_numbers<[1], [0], [0], [1], [0, 0, 1, 1], [], []>} : vector<8x32xf32>, vector<32x32xf32>, vector<8x32xf32> -> vector<8x32xf32>
    %c0_85 = arith.constant 0 : index
    %c0_86 = arith.constant 0 : index
    %c0_87 = arith.constant 0 : index
    %165 = vector.load %arg16[%c0_85, %c0_86, %c0_87] : memref<2x1x32xf32, #tpu.memory_space<vmem>>, vector<1x1x32xf32>
    %166 = vector.shape_cast %165 : vector<1x1x32xf32> to vector<1x32xf32>
    %167 = vector.broadcast %166 : vector<1x32xf32> to vector<8x32xf32>
    %168 = arith.addf %164, %167 : vector<8x32xf32>
    %169 = arith.addf %92, %168 : vector<8x32xf32>
    %c0_88 = arith.constant 0 : index
    %c0_89 = arith.constant 0 : index
    %c0_90 = arith.constant 0 : index
    %170 = vector.load %arg17[%c0_88, %c0_89, %c0_90] : memref<2x1x32xf32, #tpu.memory_space<vmem>>, vector<1x1x32xf32>
    %171 = vector.shape_cast %170 : vector<1x1x32xf32> to vector<1x32xf32>
    %c0_91 = arith.constant 0 : index
    %c0_92 = arith.constant 0 : index
    %c0_93 = arith.constant 0 : index
    %172 = vector.load %arg18[%c0_91, %c0_92, %c0_93] : memref<2x1x32xf32, #tpu.memory_space<vmem>>, vector<1x1x32xf32>
    %173 = vector.shape_cast %172 : vector<1x1x32xf32> to vector<1x32xf32>
    %cst_94 = arith.constant dense<0.000000e+00> : vector<8xf32>
    %174 = vector.multi_reduction <add>, %169, %cst_94 [1] : vector<8x32xf32> to vector<8xf32>
    %175 = vector.shape_cast %174 : vector<8xf32> to vector<8x1xf32>
    %cst_95 = arith.constant 3.200000e+01 : f32
    %176 = vector.broadcast %cst_95 : f32 to vector<8x1xf32>
    %177 = arith.divf %175, %176 : vector<8x1xf32>
    %178 = vector.broadcast %177 : vector<8x1xf32> to vector<8x32xf32>
    %179 = arith.subf %169, %178 : vector<8x32xf32>
    %180 = arith.mulf %179, %179 : vector<8x32xf32>
    %cst_96 = arith.constant dense<0.000000e+00> : vector<8xf32>
    %181 = vector.multi_reduction <add>, %180, %cst_96 [1] : vector<8x32xf32> to vector<8xf32>
    %182 = vector.shape_cast %181 : vector<8xf32> to vector<8x1xf32>
    %cst_97 = arith.constant 3.200000e+01 : f32
    %183 = vector.broadcast %cst_97 : f32 to vector<8x1xf32>
    %184 = arith.divf %182, %183 : vector<8x1xf32>
    %cst_98 = arith.constant 9.99999974E-6 : f32
    %185 = vector.broadcast %cst_98 : f32 to vector<8x1xf32>
    %186 = arith.addf %184, %185 : vector<8x1xf32>
    %187 = math.rsqrt %186 : vector<8x1xf32>
    %188 = vector.broadcast %187 : vector<8x1xf32> to vector<8x32xf32>
    %189 = arith.mulf %179, %188 : vector<8x32xf32>
    %190 = vector.broadcast %171 : vector<1x32xf32> to vector<8x32xf32>
    %191 = arith.mulf %189, %190 : vector<8x32xf32>
    %192 = vector.broadcast %173 : vector<1x32xf32> to vector<8x32xf32>
    %193 = arith.addf %191, %192 : vector<8x32xf32>
    %c0_99 = arith.constant 0 : index
    %c0_100 = arith.constant 0 : index
    %c0_101 = arith.constant 0 : index
    %194 = vector.load %arg19[%c0_99, %c0_100, %c0_101] : memref<2x32x128xf32, #tpu.memory_space<vmem>>, vector<1x32x128xf32>
    %195 = vector.shape_cast %194 : vector<1x32x128xf32> to vector<32x128xf32>
    %cst_102 = arith.constant dense<0.000000e+00> : vector<8x128xf32>
    %196 = tpu.matmul %193, %195, %cst_102 {dimension_numbers = #tpu.dot_dimension_numbers<[1], [0], [0], [1], [0, 0, 1, 1], [], []>} : vector<8x32xf32>, vector<32x128xf32>, vector<8x128xf32> -> vector<8x128xf32>
    %c0_103 = arith.constant 0 : index
    %c0_104 = arith.constant 0 : index
    %c0_105 = arith.constant 0 : index
    %197 = vector.load %arg20[%c0_103, %c0_104, %c0_105] : memref<2x1x128xf32, #tpu.memory_space<vmem>>, vector<1x1x128xf32>
    %198 = vector.shape_cast %197 : vector<1x1x128xf32> to vector<1x128xf32>
    %199 = vector.broadcast %198 : vector<1x128xf32> to vector<8x128xf32>
    %200 = arith.addf %196, %199 : vector<8x128xf32>
    %cst_106 = arith.constant 5.000000e-01 : f32
    %201 = vector.broadcast %cst_106 : f32 to vector<8x128xf32>
    %202 = arith.mulf %201, %200 : vector<8x128xf32>
    %cst_107 = arith.constant 4.471500e-02 : f32
    %203 = vector.broadcast %cst_107 : f32 to vector<8x128xf32>
    %204 = arith.mulf %203, %200 : vector<8x128xf32>
    %205 = arith.mulf %204, %200 : vector<8x128xf32>
    %206 = arith.mulf %205, %200 : vector<8x128xf32>
    %207 = arith.addf %200, %206 : vector<8x128xf32>
    %cst_108 = arith.constant 0.797884583 : f32
    %208 = vector.broadcast %cst_108 : f32 to vector<8x128xf32>
    %209 = arith.mulf %208, %207 : vector<8x128xf32>
    %210 = math.tanh %209 : vector<8x128xf32>
    %cst_109 = arith.constant 1.000000e+00 : f32
    %211 = vector.broadcast %cst_109 : f32 to vector<8x128xf32>
    %212 = arith.addf %211, %210 : vector<8x128xf32>
    %213 = arith.mulf %202, %212 : vector<8x128xf32>
    %c0_110 = arith.constant 0 : index
    %c0_111 = arith.constant 0 : index
    %c0_112 = arith.constant 0 : index
    %214 = vector.load %arg21[%c0_110, %c0_111, %c0_112] : memref<2x128x32xf32, #tpu.memory_space<vmem>>, vector<1x128x32xf32>
    %215 = vector.shape_cast %214 : vector<1x128x32xf32> to vector<128x32xf32>
    %cst_113 = arith.constant dense<0.000000e+00> : vector<8x32xf32>
    %216 = tpu.matmul %213, %215, %cst_113 {dimension_numbers = #tpu.dot_dimension_numbers<[1], [0], [0], [1], [0, 0, 1, 1], [], []>} : vector<8x128xf32>, vector<128x32xf32>, vector<8x32xf32> -> vector<8x32xf32>
    %c0_114 = arith.constant 0 : index
    %c0_115 = arith.constant 0 : index
    %c0_116 = arith.constant 0 : index
    %217 = vector.load %arg22[%c0_114, %c0_115, %c0_116] : memref<2x1x32xf32, #tpu.memory_space<vmem>>, vector<1x1x32xf32>
    %218 = vector.shape_cast %217 : vector<1x1x32xf32> to vector<1x32xf32>
    %219 = vector.broadcast %218 : vector<1x32xf32> to vector<8x32xf32>
    %220 = arith.addf %216, %219 : vector<8x32xf32>
    %221 = arith.addf %169, %220 : vector<8x32xf32>
    %c1_117 = arith.constant 1 : index
    %c0_118 = arith.constant 0 : index
    %c0_119 = arith.constant 0 : index
    %222 = vector.load %arg11[%c1_117, %c0_118, %c0_119] : memref<2x1x32xf32, #tpu.memory_space<vmem>>, vector<1x1x32xf32>
    %223 = vector.shape_cast %222 : vector<1x1x32xf32> to vector<1x32xf32>
    %c1_120 = arith.constant 1 : index
    %c0_121 = arith.constant 0 : index
    %c0_122 = arith.constant 0 : index
    %224 = vector.load %arg12[%c1_120, %c0_121, %c0_122] : memref<2x1x32xf32, #tpu.memory_space<vmem>>, vector<1x1x32xf32>
    %225 = vector.shape_cast %224 : vector<1x1x32xf32> to vector<1x32xf32>
    %cst_123 = arith.constant dense<0.000000e+00> : vector<8xf32>
    %226 = vector.multi_reduction <add>, %221, %cst_123 [1] : vector<8x32xf32> to vector<8xf32>
    %227 = vector.shape_cast %226 : vector<8xf32> to vector<8x1xf32>
    %cst_124 = arith.constant 3.200000e+01 : f32
    %228 = vector.broadcast %cst_124 : f32 to vector<8x1xf32>
    %229 = arith.divf %227, %228 : vector<8x1xf32>
    %230 = vector.broadcast %229 : vector<8x1xf32> to vector<8x32xf32>
    %231 = arith.subf %221, %230 : vector<8x32xf32>
    %232 = arith.mulf %231, %231 : vector<8x32xf32>
    %cst_125 = arith.constant dense<0.000000e+00> : vector<8xf32>
    %233 = vector.multi_reduction <add>, %232, %cst_125 [1] : vector<8x32xf32> to vector<8xf32>
    %234 = vector.shape_cast %233 : vector<8xf32> to vector<8x1xf32>
    %cst_126 = arith.constant 3.200000e+01 : f32
    %235 = vector.broadcast %cst_126 : f32 to vector<8x1xf32>
    %236 = arith.divf %234, %235 : vector<8x1xf32>
    %cst_127 = arith.constant 9.99999974E-6 : f32
    %237 = vector.broadcast %cst_127 : f32 to vector<8x1xf32>
    %238 = arith.addf %236, %237 : vector<8x1xf32>
    %239 = math.rsqrt %238 : vector<8x1xf32>
    %240 = vector.broadcast %239 : vector<8x1xf32> to vector<8x32xf32>
    %241 = arith.mulf %231, %240 : vector<8x32xf32>
    %242 = vector.broadcast %223 : vector<1x32xf32> to vector<8x32xf32>
    %243 = arith.mulf %241, %242 : vector<8x32xf32>
    %244 = vector.broadcast %225 : vector<1x32xf32> to vector<8x32xf32>
    %245 = arith.addf %243, %244 : vector<8x32xf32>
    %c1_128 = arith.constant 1 : index
    %c0_129 = arith.constant 0 : index
    %c0_130 = arith.constant 0 : index
    %246 = vector.load %arg13[%c1_128, %c0_129, %c0_130] : memref<2x32x96xf32, #tpu.memory_space<vmem>>, vector<1x32x96xf32>
    %247 = vector.shape_cast %246 : vector<1x32x96xf32> to vector<32x96xf32>
    %cst_131 = arith.constant dense<0.000000e+00> : vector<8x96xf32>
    %248 = tpu.matmul %245, %247, %cst_131 {dimension_numbers = #tpu.dot_dimension_numbers<[1], [0], [0], [1], [0, 0, 1, 1], [], []>} : vector<8x32xf32>, vector<32x96xf32>, vector<8x96xf32> -> vector<8x96xf32>
    %c1_132 = arith.constant 1 : index
    %c0_133 = arith.constant 0 : index
    %c0_134 = arith.constant 0 : index
    %249 = vector.load %arg14[%c1_132, %c0_133, %c0_134] : memref<2x1x96xf32, #tpu.memory_space<vmem>>, vector<1x1x96xf32>
    %250 = vector.shape_cast %249 : vector<1x1x96xf32> to vector<1x96xf32>
    %251 = vector.broadcast %250 : vector<1x96xf32> to vector<8x96xf32>
    %252 = arith.addf %248, %251 : vector<8x96xf32>
    %253 = vector.extract_strided_slice %252 {offsets = [0, 0], sizes = [8, 32], strides = [1, 1]} : vector<8x96xf32> to vector<8x32xf32>
    %cst_135 = arith.constant 2.500000e-01 : f32
    %254 = vector.broadcast %cst_135 : f32 to vector<8x32xf32>
    %255 = arith.mulf %253, %254 : vector<8x32xf32>
    %256 = vector.extract_strided_slice %252 {offsets = [0, 32], sizes = [8, 32], strides = [1, 1]} : vector<8x96xf32> to vector<8x32xf32>
    %257 = vector.extract_strided_slice %252 {offsets = [0, 64], sizes = [8, 32], strides = [1, 1]} : vector<8x96xf32> to vector<8x32xf32>
    %258 = vector.extract_strided_slice %255 {offsets = [0, 0], sizes = [8, 16], strides = [1, 1]} : vector<8x32xf32> to vector<8x16xf32>
    %259 = vector.extract_strided_slice %256 {offsets = [0, 0], sizes = [8, 16], strides = [1, 1]} : vector<8x32xf32> to vector<8x16xf32>
    %cst_136 = arith.constant dense<0.000000e+00> : vector<8x8xf32>
    %260 = tpu.matmul %258, %259, %cst_136 {dimension_numbers = #tpu.dot_dimension_numbers<[1], [1], [0], [0], [0, 0, 1, 0], [], []>} : vector<8x16xf32>, vector<8x16xf32>, vector<8x8xf32> -> vector<8x8xf32>
    %261 = arith.addf %260, %68 : vector<8x8xf32>
    %cst_137 = arith.constant dense<0xFF800000> : vector<8xf32>
    %262 = vector.multi_reduction <maximumf>, %261, %cst_137 [1] : vector<8x8xf32> to vector<8xf32>
    %263 = vector.shape_cast %262 : vector<8xf32> to vector<8x1xf32>
    %264 = vector.broadcast %263 : vector<8x1xf32> to vector<8x8xf32>
    %265 = arith.subf %261, %264 : vector<8x8xf32>
    %266 = math.exp %265 : vector<8x8xf32>
    %cst_138 = arith.constant dense<0.000000e+00> : vector<8xf32>
    %267 = vector.multi_reduction <add>, %266, %cst_138 [1] : vector<8x8xf32> to vector<8xf32>
    %268 = vector.shape_cast %267 : vector<8xf32> to vector<8x1xf32>
    %269 = tpu.reciprocal %268 {approx = true} : vector<8x1xf32> -> vector<8x1xf32>
    %270 = vector.broadcast %269 : vector<8x1xf32> to vector<8x8xf32>
    %271 = arith.mulf %266, %270 : vector<8x8xf32>
    %272 = vector.extract_strided_slice %257 {offsets = [0, 0], sizes = [8, 16], strides = [1, 1]} : vector<8x32xf32> to vector<8x16xf32>
    %cst_139 = arith.constant dense<0.000000e+00> : vector<8x16xf32>
    %273 = tpu.matmul %271, %272, %cst_139 {dimension_numbers = #tpu.dot_dimension_numbers<[1], [0], [0], [1], [0, 0, 1, 1], [], []>} : vector<8x8xf32>, vector<8x16xf32>, vector<8x16xf32> -> vector<8x16xf32>
    %274 = vector.extract_strided_slice %255 {offsets = [0, 16], sizes = [8, 16], strides = [1, 1]} : vector<8x32xf32> to vector<8x16xf32>
    %275 = vector.extract_strided_slice %256 {offsets = [0, 16], sizes = [8, 16], strides = [1, 1]} : vector<8x32xf32> to vector<8x16xf32>
    %cst_140 = arith.constant dense<0.000000e+00> : vector<8x8xf32>
    %276 = tpu.matmul %274, %275, %cst_140 {dimension_numbers = #tpu.dot_dimension_numbers<[1], [1], [0], [0], [0, 0, 1, 0], [], []>} : vector<8x16xf32>, vector<8x16xf32>, vector<8x8xf32> -> vector<8x8xf32>
    %277 = arith.addf %276, %68 : vector<8x8xf32>
    %cst_141 = arith.constant dense<0xFF800000> : vector<8xf32>
    %278 = vector.multi_reduction <maximumf>, %277, %cst_141 [1] : vector<8x8xf32> to vector<8xf32>
    %279 = vector.shape_cast %278 : vector<8xf32> to vector<8x1xf32>
    %280 = vector.broadcast %279 : vector<8x1xf32> to vector<8x8xf32>
    %281 = arith.subf %277, %280 : vector<8x8xf32>
    %282 = math.exp %281 : vector<8x8xf32>
    %cst_142 = arith.constant dense<0.000000e+00> : vector<8xf32>
    %283 = vector.multi_reduction <add>, %282, %cst_142 [1] : vector<8x8xf32> to vector<8xf32>
    %284 = vector.shape_cast %283 : vector<8xf32> to vector<8x1xf32>
    %285 = tpu.reciprocal %284 {approx = true} : vector<8x1xf32> -> vector<8x1xf32>
    %286 = vector.broadcast %285 : vector<8x1xf32> to vector<8x8xf32>
    %287 = arith.mulf %282, %286 : vector<8x8xf32>
    %288 = vector.extract_strided_slice %257 {offsets = [0, 16], sizes = [8, 16], strides = [1, 1]} : vector<8x32xf32> to vector<8x16xf32>
    %cst_143 = arith.constant dense<0.000000e+00> : vector<8x16xf32>
    %289 = tpu.matmul %287, %288, %cst_143 {dimension_numbers = #tpu.dot_dimension_numbers<[1], [0], [0], [1], [0, 0, 1, 1], [], []>} : vector<8x8xf32>, vector<8x16xf32>, vector<8x16xf32> -> vector<8x16xf32>
    %290 = tpu.concatenate %273, %289 in 1 : vector<8x16xf32>, vector<8x16xf32> -> vector<8x32xf32>
    %c1_144 = arith.constant 1 : index
    %c0_145 = arith.constant 0 : index
    %c0_146 = arith.constant 0 : index
    %291 = vector.load %arg15[%c1_144, %c0_145, %c0_146] : memref<2x32x32xf32, #tpu.memory_space<vmem>>, vector<1x32x32xf32>
    %292 = vector.shape_cast %291 : vector<1x32x32xf32> to vector<32x32xf32>
    %cst_147 = arith.constant dense<0.000000e+00> : vector<8x32xf32>
    %293 = tpu.matmul %290, %292, %cst_147 {dimension_numbers = #tpu.dot_dimension_numbers<[1], [0], [0], [1], [0, 0, 1, 1], [], []>} : vector<8x32xf32>, vector<32x32xf32>, vector<8x32xf32> -> vector<8x32xf32>
    %c1_148 = arith.constant 1 : index
    %c0_149 = arith.constant 0 : index
    %c0_150 = arith.constant 0 : index
    %294 = vector.load %arg16[%c1_148, %c0_149, %c0_150] : memref<2x1x32xf32, #tpu.memory_space<vmem>>, vector<1x1x32xf32>
    %295 = vector.shape_cast %294 : vector<1x1x32xf32> to vector<1x32xf32>
    %296 = vector.broadcast %295 : vector<1x32xf32> to vector<8x32xf32>
    %297 = arith.addf %293, %296 : vector<8x32xf32>
    %298 = arith.addf %221, %297 : vector<8x32xf32>
    %c1_151 = arith.constant 1 : index
    %c0_152 = arith.constant 0 : index
    %c0_153 = arith.constant 0 : index
    %299 = vector.load %arg17[%c1_151, %c0_152, %c0_153] : memref<2x1x32xf32, #tpu.memory_space<vmem>>, vector<1x1x32xf32>
    %300 = vector.shape_cast %299 : vector<1x1x32xf32> to vector<1x32xf32>
    %c1_154 = arith.constant 1 : index
    %c0_155 = arith.constant 0 : index
    %c0_156 = arith.constant 0 : index
    %301 = vector.load %arg18[%c1_154, %c0_155, %c0_156] : memref<2x1x32xf32, #tpu.memory_space<vmem>>, vector<1x1x32xf32>
    %302 = vector.shape_cast %301 : vector<1x1x32xf32> to vector<1x32xf32>
    %cst_157 = arith.constant dense<0.000000e+00> : vector<8xf32>
    %303 = vector.multi_reduction <add>, %298, %cst_157 [1] : vector<8x32xf32> to vector<8xf32>
    %304 = vector.shape_cast %303 : vector<8xf32> to vector<8x1xf32>
    %cst_158 = arith.constant 3.200000e+01 : f32
    %305 = vector.broadcast %cst_158 : f32 to vector<8x1xf32>
    %306 = arith.divf %304, %305 : vector<8x1xf32>
    %307 = vector.broadcast %306 : vector<8x1xf32> to vector<8x32xf32>
    %308 = arith.subf %298, %307 : vector<8x32xf32>
    %309 = arith.mulf %308, %308 : vector<8x32xf32>
    %cst_159 = arith.constant dense<0.000000e+00> : vector<8xf32>
    %310 = vector.multi_reduction <add>, %309, %cst_159 [1] : vector<8x32xf32> to vector<8xf32>
    %311 = vector.shape_cast %310 : vector<8xf32> to vector<8x1xf32>
    %cst_160 = arith.constant 3.200000e+01 : f32
    %312 = vector.broadcast %cst_160 : f32 to vector<8x1xf32>
    %313 = arith.divf %311, %312 : vector<8x1xf32>
    %cst_161 = arith.constant 9.99999974E-6 : f32
    %314 = vector.broadcast %cst_161 : f32 to vector<8x1xf32>
    %315 = arith.addf %313, %314 : vector<8x1xf32>
    %316 = math.rsqrt %315 : vector<8x1xf32>
    %317 = vector.broadcast %316 : vector<8x1xf32> to vector<8x32xf32>
    %318 = arith.mulf %308, %317 : vector<8x32xf32>
    %319 = vector.broadcast %300 : vector<1x32xf32> to vector<8x32xf32>
    %320 = arith.mulf %318, %319 : vector<8x32xf32>
    %321 = vector.broadcast %302 : vector<1x32xf32> to vector<8x32xf32>
    %322 = arith.addf %320, %321 : vector<8x32xf32>
    %c1_162 = arith.constant 1 : index
    %c0_163 = arith.constant 0 : index
    %c0_164 = arith.constant 0 : index
    %323 = vector.load %arg19[%c1_162, %c0_163, %c0_164] : memref<2x32x128xf32, #tpu.memory_space<vmem>>, vector<1x32x128xf32>
    %324 = vector.shape_cast %323 : vector<1x32x128xf32> to vector<32x128xf32>
    %cst_165 = arith.constant dense<0.000000e+00> : vector<8x128xf32>
    %325 = tpu.matmul %322, %324, %cst_165 {dimension_numbers = #tpu.dot_dimension_numbers<[1], [0], [0], [1], [0, 0, 1, 1], [], []>} : vector<8x32xf32>, vector<32x128xf32>, vector<8x128xf32> -> vector<8x128xf32>
    %c1_166 = arith.constant 1 : index
    %c0_167 = arith.constant 0 : index
    %c0_168 = arith.constant 0 : index
    %326 = vector.load %arg20[%c1_166, %c0_167, %c0_168] : memref<2x1x128xf32, #tpu.memory_space<vmem>>, vector<1x1x128xf32>
    %327 = vector.shape_cast %326 : vector<1x1x128xf32> to vector<1x128xf32>
    %328 = vector.broadcast %327 : vector<1x128xf32> to vector<8x128xf32>
    %329 = arith.addf %325, %328 : vector<8x128xf32>
    %cst_169 = arith.constant 5.000000e-01 : f32
    %330 = vector.broadcast %cst_169 : f32 to vector<8x128xf32>
    %331 = arith.mulf %330, %329 : vector<8x128xf32>
    %cst_170 = arith.constant 4.471500e-02 : f32
    %332 = vector.broadcast %cst_170 : f32 to vector<8x128xf32>
    %333 = arith.mulf %332, %329 : vector<8x128xf32>
    %334 = arith.mulf %333, %329 : vector<8x128xf32>
    %335 = arith.mulf %334, %329 : vector<8x128xf32>
    %336 = arith.addf %329, %335 : vector<8x128xf32>
    %cst_171 = arith.constant 0.797884583 : f32
    %337 = vector.broadcast %cst_171 : f32 to vector<8x128xf32>
    %338 = arith.mulf %337, %336 : vector<8x128xf32>
    %339 = math.tanh %338 : vector<8x128xf32>
    %cst_172 = arith.constant 1.000000e+00 : f32
    %340 = vector.broadcast %cst_172 : f32 to vector<8x128xf32>
    %341 = arith.addf %340, %339 : vector<8x128xf32>
    %342 = arith.mulf %331, %341 : vector<8x128xf32>
    %c1_173 = arith.constant 1 : index
    %c0_174 = arith.constant 0 : index
    %c0_175 = arith.constant 0 : index
    %343 = vector.load %arg21[%c1_173, %c0_174, %c0_175] : memref<2x128x32xf32, #tpu.memory_space<vmem>>, vector<1x128x32xf32>
    %344 = vector.shape_cast %343 : vector<1x128x32xf32> to vector<128x32xf32>
    %cst_176 = arith.constant dense<0.000000e+00> : vector<8x32xf32>
    %345 = tpu.matmul %342, %344, %cst_176 {dimension_numbers = #tpu.dot_dimension_numbers<[1], [0], [0], [1], [0, 0, 1, 1], [], []>} : vector<8x128xf32>, vector<128x32xf32>, vector<8x32xf32> -> vector<8x32xf32>
    %c1_177 = arith.constant 1 : index
    %c0_178 = arith.constant 0 : index
    %c0_179 = arith.constant 0 : index
    %346 = vector.load %arg22[%c1_177, %c0_178, %c0_179] : memref<2x1x32xf32, #tpu.memory_space<vmem>>, vector<1x1x32xf32>
    %347 = vector.shape_cast %346 : vector<1x1x32xf32> to vector<1x32xf32>
    %348 = vector.broadcast %347 : vector<1x32xf32> to vector<8x32xf32>
    %349 = arith.addf %345, %348 : vector<8x32xf32>
    %350 = arith.addf %298, %349 : vector<8x32xf32>
    %351 = arith.mulf %350, %55 : vector<8x32xf32>
    %cst_180 = arith.constant dense<0.000000e+00> : vector<8xf32>
    %352 = vector.multi_reduction <add>, %351, %cst_180 [1] : vector<8x32xf32> to vector<8xf32>
    %353 = vector.shape_cast %352 : vector<8xf32> to vector<8x1xf32>
    %354 = arith.mulf %350, %56 : vector<8x32xf32>
    %cst_181 = arith.constant dense<0.000000e+00> : vector<8xf32>
    %355 = vector.multi_reduction <add>, %354, %cst_181 [1] : vector<8x32xf32> to vector<8xf32>
    %356 = vector.shape_cast %355 : vector<8xf32> to vector<8x1xf32>
    %c0_182 = arith.constant 0 : index
    %c0_183 = arith.constant 0 : index
    %c0_184 = arith.constant 0 : index
    %357 = vector.load %arg3[%c0_182, %c0_183, %c0_184] : memref<1x8x1xf32, #tpu.memory_space<vmem>>, vector<1x8x1xf32>
    %358 = vector.shape_cast %357 : vector<1x8x1xf32> to vector<8x1xf32>
    %cst_185 = arith.constant 0.000000e+00 : f32
    %359 = vector.broadcast %cst_185 : f32 to vector<8x1xf32>
    %360 = arith.cmpf one, %358, %359 : vector<8x1xf32>
    %361 = arith.extui %360 : vector<8x1xi1> to vector<8x1xi32>
    %362 = arith.sitofp %361 : vector<8x1xi32> to vector<8x1xf32>
    %cst_186 = arith.constant 0.000000e+00 : f32
    %363 = vector.broadcast %cst_186 : f32 to vector<8x1xf32>
    %364 = arith.subf %363, %353 : vector<8x1xf32>
    %cst_187 = arith.constant 0.000000e+00 : f32
    %365 = vector.broadcast %cst_187 : f32 to vector<8x1xf32>
    %366 = arith.maximumf %364, %365 : vector<8x1xf32>
    %367 = math.absf %364 : vector<8x1xf32>
    %cst_188 = arith.constant 0.000000e+00 : f32
    %368 = vector.broadcast %cst_188 : f32 to vector<8x1xf32>
    %369 = arith.subf %368, %367 : vector<8x1xf32>
    %370 = math.exp %369 : vector<8x1xf32>
    %cst_189 = arith.constant 1.000000e+00 : f32
    %371 = vector.broadcast %cst_189 : f32 to vector<8x1xf32>
    %372 = arith.addf %371, %370 : vector<8x1xf32>
    %373 = math.log %372 : vector<8x1xf32>
    %374 = arith.addf %366, %373 : vector<8x1xf32>
    %cst_190 = arith.constant 0.000000e+00 : f32
    %375 = vector.broadcast %cst_190 : f32 to vector<8x1xf32>
    %376 = arith.maximumf %356, %375 : vector<8x1xf32>
    %377 = math.absf %356 : vector<8x1xf32>
    %cst_191 = arith.constant 0.000000e+00 : f32
    %378 = vector.broadcast %cst_191 : f32 to vector<8x1xf32>
    %379 = arith.subf %378, %377 : vector<8x1xf32>
    %380 = math.exp %379 : vector<8x1xf32>
    %cst_192 = arith.constant 1.000000e+00 : f32
    %381 = vector.broadcast %cst_192 : f32 to vector<8x1xf32>
    %382 = arith.addf %381, %380 : vector<8x1xf32>
    %383 = math.log %382 : vector<8x1xf32>
    %384 = arith.addf %376, %383 : vector<8x1xf32>
    %385 = arith.addf %374, %384 : vector<8x1xf32>
    %386 = arith.mulf %362, %385 : vector<8x1xf32>
    %387 = vector.shape_cast %386 : vector<8x1xf32> to vector<1x8x1xf32>
    %cst_193 = arith.constant dense<0.000000e+00> : vector<1xf32>
    %388 = vector.multi_reduction <add>, %387, %cst_193 [1, 2] : vector<1x8x1xf32> to vector<1xf32>
    %389 = vector.shape_cast %388 : vector<1xf32> to vector<1x1x1xf32>
    %390 = vector.extract %389[0, 0, 0] : f32 from vector<1x1x1xf32>
    %391 = vector.broadcast %390 : f32 to vector<1x1xf32>
    %392 = vector.shape_cast %362 : vector<8x1xf32> to vector<1x8x1xf32>
    %cst_194 = arith.constant dense<0.000000e+00> : vector<1xf32>
    %393 = vector.multi_reduction <add>, %392, %cst_194 [1, 2] : vector<1x8x1xf32> to vector<1xf32>
    %394 = vector.shape_cast %393 : vector<1xf32> to vector<1x1x1xf32>
    %395 = vector.extract %394[0, 0, 0] : f32 from vector<1x1x1xf32>
    %396 = vector.broadcast %395 : f32 to vector<1x1xf32>
    %397 = tpu.iota {dimensions = array<i32: 1>} : vector<1x128xi32>
    %c0_i32 = arith.constant 0 : i32
    %398 = vector.broadcast %c0_i32 : i32 to vector<1x128xi32>
    %399 = arith.cmpi eq, %397, %398 : vector<1x128xi32>
    %c1_i32 = arith.constant 1 : i32
    %400 = vector.broadcast %c1_i32 : i32 to vector<1x128xi32>
    %401 = arith.cmpi eq, %397, %400 : vector<1x128xi32>
    %cst_195 = arith.constant 0.000000e+00 : f32
    %402 = vector.shape_cast %396 : vector<1x1xf32> to vector<1x1xf32>
    %403 = vector.broadcast %402 : vector<1x1xf32> to vector<1x128xf32>
    %404 = vector.broadcast %cst_195 : f32 to vector<1x128xf32>
    %405 = arith.select %401, %403, %404 : vector<1x128xi1>, vector<1x128xf32>
    %406 = vector.shape_cast %391 : vector<1x1xf32> to vector<1x1xf32>
    %407 = vector.broadcast %406 : vector<1x1xf32> to vector<1x128xf32>
    %408 = arith.select %399, %407, %405 : vector<1x128xi1>, vector<1x128xf32>
    %c0_196 = arith.constant 0 : index
    %c0_197 = arith.constant 0 : index
    %c0_198 = arith.constant 0 : index
    %409 = vector.load %arg23[%c0_196, %c0_197, %c0_198] : memref<1x1x128xf32, #tpu.memory_space<vmem>>, vector<1x1x128xf32>
    %410 = vector.shape_cast %409 : vector<1x1x128xf32> to vector<1x128xf32>
    %411 = vector.shape_cast %408 : vector<1x128xf32> to vector<1x1x128xf32>
    tpu.vector_store %arg23[%c0_196, %c0_197, %c0_198], %411 {strides = array<i32>} : memref<1x1x128xf32, #tpu.memory_space<vmem>>, vector<1x1x128xf32>,
    return
  }
  func.func @transform_0(%arg0: i32) -> (i32, i32, i32, i32) {
    %c0_i32 = arith.constant 0 : i32
    %c0_i32_0 = arith.constant 0 : i32
    %c0_i32_1 = arith.constant 0 : i32
    %c0_i32_2 = arith.constant 0 : i32
    return %arg0, %c0_i32, %c0_i32_0, %c0_i32_1 : i32, i32, i32, i32
  }
  func.func @transform_1(%arg0: i32) -> (i32, i32, i32) {
    %c0_i32 = arith.constant 0 : i32
    %c0_i32_0 = arith.constant 0 : i32
    %c0_i32_1 = arith.constant 0 : i32
    return %arg0, %c0_i32, %c0_i32_0 : i32, i32, i32
  }
  func.func @transform_2(%arg0: i32) -> (i32, i32, i32) {
    %c0_i32 = arith.constant 0 : i32
    %c0_i32_0 = arith.constant 0 : i32
    %c0_i32_1 = arith.constant 0 : i32
    return %arg0, %c0_i32, %c0_i32_0 : i32, i32, i32
  }
  func.func @transform_3(%arg0: i32) -> (i32, i32) {
    %c0_i32 = arith.constant 0 : i32
    %c0_i32_0 = arith.constant 0 : i32
    %c0_i32_1 = arith.constant 0 : i32
    return %c0_i32, %c0_i32_0 : i32, i32
  }
  func.func @transform_4(%arg0: i32) -> (i32, i32) {
    %c0_i32 = arith.constant 0 : i32
    %c0_i32_0 = arith.constant 0 : i32
    %c0_i32_1 = arith.constant 0 : i32
    return %c0_i32, %c0_i32_0 : i32, i32
  }
  func.func @transform_5(%arg0: i32) -> (i32, i32, i32) {
    %c0_i32 = arith.constant 0 : i32
    %c0_i32_0 = arith.constant 0 : i32
    %c0_i32_1 = arith.constant 0 : i32
    %c0_i32_2 = arith.constant 0 : i32
    return %c0_i32, %c0_i32_0, %c0_i32_1 : i32, i32, i32
  }
  func.func @transform_6(%arg0: i32) -> (i32, i32, i32) {
    %c0_i32 = arith.constant 0 : i32
    %c0_i32_0 = arith.constant 0 : i32
    %c0_i32_1 = arith.constant 0 : i32
    %c0_i32_2 = arith.constant 0 : i32
    return %c0_i32, %c0_i32_0, %c0_i32_1 : i32, i32, i32
  }
  func.func @transform_7(%arg0: i32) -> (i32, i32) {
    %c0_i32 = arith.constant 0 : i32
    %c0_i32_0 = arith.constant 0 : i32
    %c0_i32_1 = arith.constant 0 : i32
    return %c0_i32, %c0_i32_0 : i32, i32
  }
  func.func @transform_8(%arg0: i32) -> (i32, i32) {
    %c0_i32 = arith.constant 0 : i32
    %c0_i32_0 = arith.constant 0 : i32
    %c0_i32_1 = arith.constant 0 : i32
    return %c0_i32, %c0_i32_0 : i32, i32
  }
  func.func @transform_9(%arg0: i32) -> (i32, i32) {
    %c0_i32 = arith.constant 0 : i32
    %c0_i32_0 = arith.constant 0 : i32
    %c0_i32_1 = arith.constant 0 : i32
    return %c0_i32, %c0_i32_0 : i32, i32
  }
  func.func @transform_10(%arg0: i32) -> (i32, i32, i32) {
    %c0_i32 = arith.constant 0 : i32
    %c0_i32_0 = arith.constant 0 : i32
    %c0_i32_1 = arith.constant 0 : i32
    %c0_i32_2 = arith.constant 0 : i32
    return %c0_i32, %c0_i32_0, %c0_i32_1 : i32, i32, i32
  }
  func.func @transform_11(%arg0: i32) -> (i32, i32, i32) {
    %c0_i32 = arith.constant 0 : i32
    %c0_i32_0 = arith.constant 0 : i32
    %c0_i32_1 = arith.constant 0 : i32
    %c0_i32_2 = arith.constant 0 : i32
    return %c0_i32, %c0_i32_0, %c0_i32_1 : i32, i32, i32
  }
  func.func @transform_12(%arg0: i32) -> (i32, i32, i32) {
    %c0_i32 = arith.constant 0 : i32
    %c0_i32_0 = arith.constant 0 : i32
    %c0_i32_1 = arith.constant 0 : i32
    %c0_i32_2 = arith.constant 0 : i32
    return %c0_i32, %c0_i32_0, %c0_i32_1 : i32, i32, i32
  }
  func.func @transform_13(%arg0: i32) -> (i32, i32, i32) {
    %c0_i32 = arith.constant 0 : i32
    %c0_i32_0 = arith.constant 0 : i32
    %c0_i32_1 = arith.constant 0 : i32
    %c0_i32_2 = arith.constant 0 : i32
    return %c0_i32, %c0_i32_0, %c0_i32_1 : i32, i32, i32
  }
  func.func @transform_14(%arg0: i32) -> (i32, i32, i32) {
    %c0_i32 = arith.constant 0 : i32
    %c0_i32_0 = arith.constant 0 : i32
    %c0_i32_1 = arith.constant 0 : i32
    %c0_i32_2 = arith.constant 0 : i32
    return %c0_i32, %c0_i32_0, %c0_i32_1 : i32, i32, i32
  }
  func.func @transform_15(%arg0: i32) -> (i32, i32, i32) {
    %c0_i32 = arith.constant 0 : i32
    %c0_i32_0 = arith.constant 0 : i32
    %c0_i32_1 = arith.constant 0 : i32
    %c0_i32_2 = arith.constant 0 : i32
    return %c0_i32, %c0_i32_0, %c0_i32_1 : i32, i32, i32
  }
  func.func @transform_16(%arg0: i32) -> (i32, i32, i32) {
    %c0_i32 = arith.constant 0 : i32
    %c0_i32_0 = arith.constant 0 : i32
    %c0_i32_1 = arith.constant 0 : i32
    %c0_i32_2 = arith.constant 0 : i32
    return %c0_i32, %c0_i32_0, %c0_i32_1 : i32, i32, i32
  }
  func.func @transform_17(%arg0: i32) -> (i32, i32, i32) {
    %c0_i32 = arith.constant 0 : i32
    %c0_i32_0 = arith.constant 0 : i32
    %c0_i32_1 = arith.constant 0 : i32
    %c0_i32_2 = arith.constant 0 : i32
    return %c0_i32, %c0_i32_0, %c0_i32_1 : i32, i32, i32
  }
  func.func @transform_18(%arg0: i32) -> (i32, i32, i32) {
    %c0_i32 = arith.constant 0 : i32
    %c0_i32_0 = arith.constant 0 : i32
    %c0_i32_1 = arith.constant 0 : i32
    %c0_i32_2 = arith.constant 0 : i32
    return %c0_i32, %c0_i32_0, %c0_i32_1 : i32, i32, i32
  }
  func.func @transform_19(%arg0: i32) -> (i32, i32, i32) {
    %c0_i32 = arith.constant 0 : i32
    %c0_i32_0 = arith.constant 0 : i32
    %c0_i32_1 = arith.constant 0 : i32
    %c0_i32_2 = arith.constant 0 : i32
    return %c0_i32, %c0_i32_0, %c0_i32_1 : i32, i32, i32
  }
  func.func @transform_20(%arg0: i32) -> (i32, i32, i32) {
    %c0_i32 = arith.constant 0 : i32
    %c0_i32_0 = arith.constant 0 : i32
    %c0_i32_1 = arith.constant 0 : i32
    %c0_i32_2 = arith.constant 0 : i32
    return %c0_i32, %c0_i32_0, %c0_i32_1 : i32, i32, i32
  }
  func.func @transform_21(%arg0: i32) -> (i32, i32, i32) {
    %c0_i32 = arith.constant 0 : i32
    %c0_i32_0 = arith.constant 0 : i32
    %c0_i32_1 = arith.constant 0 : i32
    %c0_i32_2 = arith.constant 0 : i32
    return %c0_i32, %c0_i32_0, %c0_i32_1 : i32, i32, i32
  }
  func.func @transform_22(%arg0: i32) -> (i32, i32, i32) {
    %c0_i32 = arith.constant 0 : i32
    %c0_i32_0 = arith.constant 0 : i32
    %c0_i32_1 = arith.constant 0 : i32
    return %arg0, %c0_i32, %c0_i32_0 : i32, i32, i32
  }
}

</mosaic_0001>

<bundles_post_ra>
// kernel: tpu_custom_call.1
= control target key start
LH: loop header
LB: loop body
LE: loop exit
PB: predicated region body
PF: predicated region fallthrough
CT: control target
= control target key end

     0   :  { %s4132_s0 = inlined_call_operand.vmem [shape: f32[2,2,9,64], index: 0, kind: input, shape index: {}]   ;;  %s4133_s1 = inlined_call_operand.vmem [shape: f32[2,1,8], index: 1, kind: input, shape index: {}]   ;;  %s4134_s2 = inlined_call_operand.vmem [shape: f32[2,8,1], index: 2, kind: input, shape index: {}]   ;;  %s4135_s3 = inlined_call_operand.vmem [shape: f32[64,32], index: 3, kind: input, shape index: {}]   ;;  %s4136_s4 = inlined_call_operand.vmem [shape: f32[1,32], index: 4, kind: input, shape index: {}]   ;;  %s4137_s5 = inlined_call_operand.vmem [shape: f32[1,32,32], index: 5, kind: input, shape index: {}]   ;;  %s4138_s6 = inlined_call_operand.vmem [shape: f32[1,1,32], index: 6, kind: input, shape index: {}]   ;;  %s4139_s7 = inlined_call_operand.vmem [shape: f32[8,32], index: 7, kind: input, shape index: {}]   ;;  %s4140_s8 = inlined_call_operand.vmem [shape: f32[1,32], index: 8, kind: input, shape index: {}]   ;;  %s4141_s9 = inlined_call_operand.vmem [shape: f32[1,32], index: 9, kind: input, shape index: {}]   ;;  %s4142_s10 = inlined_call_operand.vmem [shape: f32[2,1,32], index: 10, kind: input, shape index: {}]   ;;  %s4143_s11 = inlined_call_operand.vmem [shape: f32[2,1,32], index: 11, kind: input, shape index: {}]   ;;  %s4144_s12 = inlined_call_operand.vmem [shape: f32[2,32,96], index: 12, kind: input, shape index: {}]   ;;  %s4145_s13 = inlined_call_operand.vmem [shape: f32[2,1,96], index: 13, kind: input, shape index: {}]   ;;  %s4146_s14 = inlined_call_operand.vmem [shape: f32[2,32,32], index: 14, kind: input, shape index: {}]   ;;  %s4147_s15 = inlined_call_operand.vmem [shape: f32[2,1,32], index: 15, kind: input, shape index: {}]   ;;  %s4148_s16 = inlined_call_operand.vmem [shape: f32[2,1,32], index: 16, kind: input, shape index: {}]   ;;  %s4149_s17 = inlined_call_operand.vmem [shape: f32[2,1,32], index: 17, kind: input, shape index: {}]   ;;  %s4150_s18 = inlined_call_operand.vmem [shape: f32[2,32,128], index: 18, kind: input, shape index: {}]   ;;  %s4151_s19 = inlined_call_operand.vmem [shape: f32[2,1,128], index: 19, kind: input, shape index: {}]   ;;  %s4152_s20 = inlined_call_operand.vmem [shape: f32[2,128,32], index: 20, kind: input, shape index: {}]   ;;  %s4153_s21 = inlined_call_operand.vmem [shape: f32[2,1,32], index: 21, kind: input, shape index: {}]   ;;  %s4154_s22 = inlined_call_operand.hbm [shape: f32[2,1,128], index: 22, kind: output, shape index: {}]  }
   0x1   :  { %4170 = sst [smem:[#allocation10_spill]] %s4132_s0 }
   0x2   :  { %4171 = sst [smem:[#allocation11_spill]] %s4133_s1 }
   0x3   :  { %4172 = sst [smem:[#allocation12_spill]] %s4134_s2 }
   0x4   :  { %4173 = sst [smem:[#allocation13_spill]] %s4135_s3 }
   0x5   :  { %4174 = sst [smem:[#allocation14_spill]] %s4136_s4 }
   0x6   :  { %4175 = sst [smem:[#allocation15_spill]] %s4137_s5 }
   0x7   :  { %4176 = sst [smem:[#allocation16_spill]] %s4138_s6 }
   0x8   :  { %4177 = sst [smem:[#allocation17_spill]] %s4139_s7 }
   0x9   :  { %4178 = sst [smem:[#allocation18_spill]] %s4140_s8 }
   0xa   :  { %4179 = sst [smem:[#allocation19_spill]] %s4141_s9 }
   0xb   :  { %27 = vsyncpa [#allocation3], 0 }
   0xc   :  { %29 = vsyncpa [#allocation3 + $0x1], 0  ;;  %s3543_s3 = smov 0   ;;  %s3545_s28 = smov 0  }
   0xd   :  { %s3547_s29 = smov 0   ;;  %s3549_s30 = smov 0  }
   0xe LB: > { %4180 = sst [smem:[#allocation5_spill]] %s3403_s3  ;;  %s3564_s4 = sadd.s32 4294967295, %s3415_s30   ;;  %s3415_s30 = sphi %s3549_s30, %s4205_s30   ;;  %s3411_s29 = sphi %s3547_s29, %s4207_s29   ;;  %s3407_s28 = sphi %s3545_s28, %s4209_s28   ;;  %s3403_s3 = sphi %s3543_s3, %s4208_s3  }
   0xf   : > { %4181 = sst [smem:[#allocation6_spill]] %s3411_s29  ;;  %s2813_s0 = sadd.s32 4294967294, %s3415_s30  }
  0x10   : > { %s3568_s23 = sadd.s32 1, %s3415_s30   ;;  %s519_s1 = sadd.s32 1, %s3411_s29 }
  0x11   : > { %4182 = sst [smem:[#allocation7_spill]] %s3568_s23  ;;  %s516_s5 = ssub.s32 %s3415_s30, %s3568_s23 }
  0x12   : > { %p529_p0 = scmp.ne.s32.totalorder %s3411_s29, %s3407_s28  ;;  %p517_p1 = scmp.eq.s32.totalorder %s516_s5, 0 }
  0x13   : > { %p530_p2 = scmp.eq.s32.totalorder %s3564_s4, 1  ;;  %p535_p3 = scmp.ne.s32.totalorder %s3407_s28, %s3403_s3 }
  0x14   : > { %p536_p4 = scmp.eq.s32.totalorder %s2813_s0, 1  ;;  %p2816_p7 = scmp.ge.s32.totalorder %s3415_s30, 1 }
  0x15   : > { %s3579_s24 = scalar_select %p517_p1, %s3411_s29, %s519_s1  }
  0x16   : > { %p3581_p5 = por %p530_p2, %p529_p0  ;;  %p3585_p6 = por %p536_p4, %p535_p3 }
  0x17   : > { %4183 = sst [smem:[#allocation8_spill]] %s3579_s24  ;;  %p632_p8 = scmp.lt.s32.totalorder %s3415_s30, 3 }
  0x18   : > { %s4185_s25 = scalar_select %p3585_p6, 1, 0 }
  0x19   : > { %p633_p9 = pnand %p2816_p7, %p632_p8 }
  0x1a   : > { %4186 = sst [smem:[#allocation9_spill]] %s4185_s25  ;;  %p700_p10 = scmp.lt.s32.totalorder (!%p633_p9), %s3564_s4, 1 }
  0x1b   : > { %636 = sbr.rel (%p633_p9) target bundleno = 6433 (0x1921), region = 108  ;;  %s4187_s27 = sld [smem:[#allocation13_spill]] (!%p633_p9) }
  0x1c   : > { %s4188_s25 = sld [smem:[#allocation10_spill]] (!%p633_p9)  ;;  %s4166_s5 = smov (!%p633_p9), 64  }
  0x1d   : > { %s4189_s26 = sld [smem:[#allocation15_spill]] (!%p633_p9)  ;;  %s4164_s23 = smov (!%p633_p9), 48  }
  0x1e   : > { %s4190_s2 = sld [smem:[#allocation14_spill]] (!%p633_p9)  ;;  %s4201_s3 = smov (!%p633_p9), 16  }
  0x1f   : > { %s4192_s7 = sld [smem:[#allocation17_spill]] (!%p633_p9) }
  0x20   : > { %s3602_s29 = scalar_select %p700_p10, %s3564_s4, 1  ;;  %vm729_vm0 = vcmask 523264   ;;  %vm822_vm1 = vcmask 261120   ;;  %vm2658_vm2 = vcmask 1046528   ;;  %vm3418_vm3 = vmmov 0  }
  0x21   : > { %v721_v0 = vld [vmem:[%s4187_s27 + $0x38] sm:$0xff]  ;;  %v720_v1 = vld [vmem:[%s4187_s27 + $0x30] sm:$0xff]  ;;  %v719_v2 = vld [vmem:[%s4187_s27 + $0x28] sm:$0xff]  ;;  %s4193_s8 = sld [smem:[#allocation18_spill]]  ;;  %vm1259_vm4 = vcmask 130048   ;;  %vm1335_vm9 = vcmask 64512  }
  0x22   : > { %3021 = vmatprep.subr.mxu0 %v721_v0  ;;  %3051 = vmatprep.subr.mxu1 %v721_v0  ;;  %v718_v3 = vld [vmem:[%s4187_s27 + $0x20] sm:$0xff]  ;;  %s2908_s0 = sshll.u32 %s3602_s29, 5  ;;  %v717_v4 = vld [vmem:[%s4187_s27 + $0x18] sm:$0xff]  ;;  %v716_v6 = vld [vmem:[%s4187_s27 + $0x10] sm:$0xff]  ;;  %s4194_s9 = sld [smem:[#allocation19_spill]]  ;;  %vm2696_vm11 = vcmask 7168  }
  0x23   : > { %3022 = vmatpush3.msra.mxu0 %v721_v0  ;;  %3052 = vmatpush3.msra.mxu1 %v721_v0  ;;  %s3611_s24 = scalar_lea.vmem %s4188_s25, %s2908_s0  ;;  %v715_v7 = vld [vmem:[%s4187_s27 + $0x8] sm:$0xff]  ;;  %v714_v8 = vld [vmem:[%s4187_s27] sm:$0xff]  ;;  %v814_v10 = vld [vmem:[%s4189_s26 + $0x18] sm:$0xff]  ;;  %s4191_s25 = sld [smem:[#allocation16_spill]] }
  0x24   : > { %3023 = vmatprep.subr.mxu0 %v720_v1  ;;  %3053 = vmatprep.subr.mxu1 %v720_v1  ;;  %v712_v5 = vld [vmem:[%s3611_s24] sm:$0xff]  ;;  %v713_v9 = vld [vmem:[%s3611_s24 + $0x8] sm:$0x1]  ;;  %v813_v11 = vld [vmem:[%s4189_s26 + $0x10] sm:$0xff]  ;;  %s4169_s27 = smov 96   ;;  %s4195_s0 = sld [smem:[#allocation11_spill]] }
  0x25   : > { %3024 = vmatpush3.msra.mxu0 %v720_v1  ;;  %3054 = vmatpush3.msra.mxu1 %v720_v1  ;;  %v812_v12 = vld [vmem:[%s4189_s26 + $0x8] sm:$0xff]  ;;  %v811_v13 = vld [vmem:[%s4189_s26] sm:$0xff]  ;;  %v2826_v53 = vld [vmem:[%s3611_s24 + $0x10] sm:$0xff] }
  0x26   : > { %3025 = vmatprep.subr.mxu0 %v719_v2  ;;  %3055 = vmatprep.subr.mxu1 %v719_v2  ;;  %v3644_v15 = vld [vmem:[%s4190_s2] ss:$0 sm:$0xff]  ;;  %v2827_v54 = vld [vmem:[%s3611_s24 + $0x18] sm:$0x1]  ;;  %s4167_s2 = smov 80   ;;  %s4165_s24 = smov 112  }
  0x27   : > { %3026 = vmatpush3.msra.mxu0 %v719_v2  ;;  %3056 = vmatpush3.msra.mxu1 %v719_v2  ;;  %v1110_v41 = vld [vmem:[%s4192_s7] sm:$0xff] }
  0x28   : > { %3027 = vmatprep.subr.mxu0 %v718_v3  ;;  %3037 = vmatprep.mubr.msk.f32.mxu0 %vm729_vm0, %v712_v5  ;;  %v2832_v59 = vld [vmem:[%s4193_s8] ss:$0 sm:$0xff] }
  0x29   : > { %3028 = vmatpush3.msra.mxu0 %v718_v3  ;;  %3057 = vmatprep.subr.mxu1 %v718_v3  ;;  %v2823_v19 = vld [vmem:[%s4191_s25] ss:$0 sm:$0xff] }
  0x2a   : > { %3029 = vmatprep.subr.mxu0 %v717_v4  ;;  %3058 = vmatpush3.msra.mxu1 %v718_v3  ;;  %v2833_v61 = vld [vmem:[%s4194_s9] ss:$0 sm:$0xff]  ;;  %s707_s1 = scalar_lea.vmem %s4195_s0, %s3602_s29  ;;  %s4199_s0 = smov 112  }
  0x2b   : > { %3030 = vmatpush3.msra.mxu0 %v717_v4  ;;  %3059 = vmatprep.subr.mxu1 %v717_v4 }
  0x2c   : > { %3031 = vmatprep.subr.mxu0 %v716_v6  ;;  %3060 = vmatpush3.msra.mxu1 %v717_v4 }
  0x2d   : > { %3032 = vmatpush3.msra.mxu0 %v716_v6  ;;  %3061 = vmatprep.subr.mxu1 %v716_v6 }
  0x2e   : > { %3033 = vmatprep.subr.mxu0 %v715_v7  ;;  %3062 = vmatpush3.msra.mxu1 %v716_v6 }
  0x2f   : > { %3034 = vmatpush3.msra.mxu0 %v715_v7  ;;  %3063 = vmatprep.subr.mxu1 %v715_v7 }
  0x30   : > { %3035 = vmatprep.subr.mxu0 %v714_v8  ;;  %3064 = vmatpush3.msra.mxu1 %v715_v7 }
  0x31   : > { %3036 = vmatpush3.msra.mxu0 %v714_v8  ;;  %3065 = vmatprep.subr.mxu1 %v714_v8 }
  0x32   : > { %3038 = vmatmul.mubr.msk.f32.vlgmr.msra.gmra.mxu0 %vm729_vm0, %v713_v9  ;;  %3040 = vmatprep.subr.mxu0 %v814_v10 }
  0x33   : > { %3041 = vmatpush3.msra.mxu0 %v814_v10  ;;  %3066 = vmatpush3.msra.mxu1 %v714_v8 }
  0x34   : > { %3042 = vmatprep.subr.mxu0 %v813_v11  ;;  %3067 = vmatprep.mubr.msk.f32.mxu1 %vm729_vm0, %v2826_v53 }
  0x35   : > { %3043 = vmatpush3.msra.mxu0 %v813_v11  ;;  %3068 = vmatmul.mubr.msk.f32.vlgmr.msra.gmra.mxu1 %vm729_vm0, %v2827_v54 }
  0x36   : > { %3044 = vmatprep.subr.mxu0 %v812_v12 }
  0x37   : > { %3045 = vmatpush3.msra.mxu0 %v812_v12 }
  0x38   : > { %3046 = vmatprep.subr.mxu0 %v811_v13 }
  0x39   : > { %3047 = vmatpush3.msra.mxu0 %v811_v13 }
  0x3a   : > { %3070 = vmatprep.subr.mxu0 %v814_v10 }
  0xf2   : > { %v3039_v14 = vpop.f32.mrf.mxu0 }
  0xf3   : > { %v808_v18 = vadd.f32 %v3039_v14, %v3644_v15  ;;  %v1171_v14 = vld [vmem:[%s4144_s12] sm:$0xff] }
  0xf4   : > { %v802_v16 = vpop.f32.mrf.mxu0 }
  0xf5   : > { %v803_v17 = vadd.f32 %v3644_v15, %v802_v16  ;;  %v3069_v1 = vpop.f32.mrf.mxu1 }
  0xf6   : > { %v1003_v2 = vadd.f32 %v3069_v1, %v3644_v15 }
  0xf7   : > { %3048 = vmatprep.mubr.msk.f32.mxu0 %vm822_vm1, %v803_v17  ;;  %v997_v3 = vpop.f32.mrf.mxu1 }
  0xf8   : > { %3049 = vmatmul.mubr.msk.f32.vlgmr.msra.gmra.mxu0 %vm822_vm1, %v808_v18  ;;  %v998_v4 = vadd.f32 %v3644_v15, %v997_v3 }
  0xf9   : > { %3071 = vmatpush3.msra.mxu0 %v814_v10  ;;  %v3417_v10 = vmov 0.0  }
  0xfa   : > { %3072 = vmatprep.subr.mxu0 %v813_v11  ;;  %3078 = vmatprep.mubr.msk.f32.mxu0 %vm822_vm1, %v998_v4 }
  0xfb   : > { %3073 = vmatpush3.msra.mxu0 %v813_v11  ;;  %v1174_v11 = vld [vmem:[%s4144_s12 + $0x18] sm:$0xff]  ;;  %3097 = vmatprep.subr.mxu1 %v3417_v10 }
  0xfc   : > { %3074 = vmatprep.subr.mxu0 %v812_v12  ;;  %3099 = vmatprep.mubr.msk.f32.mxu1 %vm3418_vm3, %v3417_v10 }
  0xfd   : > { %3075 = vmatpush3.msra.mxu0 %v812_v12  ;;  %v1173_v12 = vld [vmem:[%s4144_s12 + $0x10] sm:$0xff] }
  0xfe   : > { %3076 = vmatprep.subr.mxu0 %v811_v13 }
  0xff   : > { %3077 = vmatpush3.msra.mxu0 %v811_v13  ;;  %v1172_v13 = vld [vmem:[%s4144_s12 + $0x8] sm:$0xff] }
 0x100   : > { %3079 = vmatmul.mubr.msk.f32.vlgmr.msra.gmra.mxu0 %vm822_vm1, %v1003_v2  ;;  %3081 = vmatprep.subr.mxu0 %v3417_v10 }
 0x101   : > { %3082 = vmatpush3.msra.mxu0 %v1174_v11  ;;  %3089 = vmatprep.mubr.msk.f32.mxu0 %vm3418_vm3, %v3417_v10  ;;  %v1594_v11 = vld [vmem:[%s4146_s14 + $0x8] sm:$0xff] }
 0x102   : > { %3083 = vmatprep.subr.mxu0 %v3417_v10 }
 0x103   : > { %3084 = vmatpush3.msra.mxu0 %v1173_v12  ;;  %v1593_v12 = vld [vmem:[%s4146_s14] sm:$0xff] }
 0x104   : > { %3085 = vmatprep.subr.mxu0 %v3417_v10 }
 0x105   : > { %3086 = vmatpush3.msra.mxu0 %v1172_v13 }
 0x106   : > { %3087 = vmatprep.subr.mxu0 %v3417_v10 }
 0x107   : > { %3088 = vmatpush3.msra.mxu0 %v1171_v14 }
 0x108   : > { %3092 = vmatprep.subr.mxu0 %v3417_v10 }
 0x1b8   : > { %v3050_v20 = vpop.f32.mrf.mxu0 }
 0x1b9   : > { %v901_v21 = vadd.f32 %v3050_v20, %v2823_v19  ;;  %v2834_v20 = vld [vmem:[%s4142_s10] ss:$0 sm:$0xff] }
 0x1ba   : > { %v895_v22 = vpop.f32.mrf.mxu0 }
 0x1bb   : > { %v907_v23 = vmul.f32 0.044715, %v901_v21  ;;  %v896_v24 = vadd.f32 %v2823_v19, %v895_v22  ;;  %v905_v35 = vmul.f32 0.5, %v901_v21  ;;  %v2835_v22 = vld [vmem:[%s4143_s11] ss:$0 sm:$0xff] }
 0x1bd   : > { %v909_v25 = vmul.f32 %v907_v23, %v901_v21  ;;  %v906_v26 = vmul.f32 0.044715, %v896_v24  ;;  %v904_v38 = vmul.f32 0.5, %v896_v24 }
 0x1bf   : > { %v911_v27 = vmul.f32 %v909_v25, %v901_v21  ;;  %v908_v28 = vmul.f32 %v906_v26, %v896_v24  ;;  %v2836_v26 = vld [vmem:[%s4145_s13] ss:$0 sm:$0xff] }
 0x1c0   : > { %v3080_v15 = vpop.f32.mrf.mxu0 }
 0x1c1   : > { %v913_v29 = vadd.f32 %v911_v27, %v901_v21  ;;  %v910_v30 = vmul.f32 %v908_v28, %v896_v24 }
 0x1c2   : > { %v3711_v25 = vpop.f32.mrf.mxu0 }
 0x1c3   : > { %v915_v31 = vmul.f32 0.7978846, %v913_v29  ;;  %v912_v32 = vadd.f32 %v910_v30, %v896_v24 }
 0x1c5   : > { %v914_v33 = vmul.f32 0.7978846, %v912_v32  ;;  %3310 = vtanh.f32 %v915_v31 }
 0x1c7   : > { %3312 = vtanh.f32 %v914_v33 }
 0x1d2   : > { %v3311_v34 = vpop.eup %3310 }
 0x1d3   : > { %v919_v36 = vadd.f32 1.0, %v3311_v34  ;;  %v1097_v34 = vlaneseq }
 0x1d4   : > { %v3313_v37 = vpop.eup %3312 }
 0x1d5   : > { %v918_v39 = vadd.f32 1.0, %v3313_v37  ;;  %v921_v40 = vmul.f32 %v919_v36, %v905_v35  ;;  %v1095_v35 = vld [vmem:[%s707_s1] sm:$0x1]  ;;  %v1098_v36 = vshrl.u32 %v1097_v34, 7  ;;  %s4200_s1 = smov 48  }
 0x1d6   : > { %vm1096_vm5 = vcmp.ne.f32.partialorder %v1095_v35, 0.0 }
 0x1d7   : > { %v920_v42 = vmul.f32 %v918_v39, %v904_v38  ;;  %v2660_v45 = vrot.slane %v921_v40, 1  ;;  %v1105_v37 = vsub.s32 0, %v1098_v36  ;;  %v3422_v38 = vmov 0  }
 0x1d8   : > { %v1102_v39 = vsel %vm1096_vm5, 1, %v3422_v38  ;;  %v3738_v40 = vand.u32 127, %v1097_v34  ;;  %v2846_v38 = vld [vmem:[%s4148_s16] ss:$0 sm:$0xff] }
 0x1d9   : > { %v1111_v43 = vadd.f32 %v1110_v41, %v920_v42  ;;  %v2659_v44 = vrot.slane %v920_v42, 1  ;;  %v1106_v41 = vrot.slane %v1102_v39, %v1105_v37  ;;  %v3423_v42 = vmov -1e+09  }
 0x1da   : > { %vm1101_vm6 = vcmp.le.s32.totalorder %v3738_v40, %v1098_v36  ;;  %vm2718_vm12 = vcmp.eq.s32.totalorder %v3738_v40, 1  ;;  %vm2717_vm13 = vcmp.eq.s32.totalorder %v3738_v40, 0 }
 0x1db   : > { %v1114_v46 = vsel %vm822_vm1, %v1111_v43, 0.0  ;;  %v3657_v47 = vsel %vm2658_vm2, %v2659_v44, %v2660_v45  ;;  %vm1107_vm7 = vcmp.eq.s32.totalorder %v1106_v41, 1  ;;  %v2847_v41 = vld [vmem:[%s4149_s17] ss:$0 sm:$0xff] }
 0x1dc   : > { %1115 = vadd.xlane.f32.xlu0 %v1114_v46  ;;  %vm1108_vm8 = vmand %vm1101_vm6, %vm1107_vm7 }
 0x265   : > { %v1116_v48 = vpop.xlane.xlu0 %1115 }
 0x266   : > { %v1118_v49 = vmul.f32 0.03125, %v1116_v48 }
 0x268   : > { %v1119_v50 = vsub.f32 %v1111_v43, %v1118_v49  ;;  %v3741_v43 = vsel %vm1108_vm8, 0.0, %v3423_v42 }
 0x26a   : > { %v1120_v51 = vmul.f32 %v1119_v50, %v1119_v50 }
 0x26c   : > { %v1121_v52 = vsel %vm822_vm1, %v1120_v51, 0.0 }
 0x26d   : > { %1122 = vadd.xlane.f32.xlu0 %v1121_v52 }
 0x2f6   : > { %v1123_v55 = vpop.xlane.xlu0 %1122 }
 0x2f7   : > { %v1124_v56 = vmul.f32 0.03125, %v1123_v55 }
 0x2f9   : > { %v1125_v57 = vadd.f32 1e-05, %v1124_v56 }
 0x2fb   : > { %3314 = vrsqrt.f32 %v1125_v57 }
 0x308   : > { %v3315_v58 = vpop.eup %3314 }
 0x309   : > { %v1127_v60 = vmul.f32 %v3315_v58, %v1119_v50 }
 0x30b   : > { %v1134_v62 = vmul.f32 %v2832_v59, %v1127_v60 }
 0x30d   : > { %v3670_v63 = vadd.f32 %v2833_v61, %v1134_v62 }
 0x30f   : > { %v1144_v0 = vsel %vm822_vm1, %v3670_v63, 0.0 }
 0x310   : > { %1145 = vadd.xlane.f32.xlu1 %v1144_v0 }
 0x399   : > { %v1146_v5 = vpop.xlane.xlu1 %1145 }
 0x39a   : > { %v1147_v6 = vmul.f32 0.03125, %v1146_v5 }
 0x39c   : > { %v1148_v7 = vsub.f32 %v3670_v63, %v1147_v6 }
 0x39e   : > { %v1149_v8 = vmul.f32 %v1148_v7, %v1148_v7 }
 0x3a0   : > { %v1150_v9 = vsel %vm822_vm1, %v1149_v8, 0.0  ;;  %v1596_v8 = vld [vmem:[%s4146_s14 + $0x18] sm:$0xff] }
 0x3a1   : > { %1151 = vadd.xlane.f32.xlu1 %v1150_v9  ;;  %v1595_v9 = vld [vmem:[%s4146_s14 + $0x10] sm:$0xff] }
 0x42a   : > { %v1152_v16 = vpop.xlane.xlu1 %1151 }
 0x42b   : > { %v1153_v17 = vmul.f32 0.03125, %v1152_v16 }
 0x42d   : > { %v1154_v18 = vadd.f32 1e-05, %v1153_v17 }
 0x42f   : > { %3316 = vrsqrt.f32 %v1154_v18 }
 0x43c   : > { %v3317_v19 = vpop.eup %3316 }
 0x43d   : > { %v1156_v21 = vmul.f32 %v3317_v19, %v1148_v7  ;;  %v2844_v19 = vld [vmem:[%s4147_s15] ss:$0 sm:$0xff] }
 0x43f   : > { %v1163_v23 = vmul.f32 %v2834_v20, %v1156_v21 }
 0x441   : > { %v1170_v24 = vadd.f32 %v2835_v22, %v1163_v23 }
 0x443   : > { %3090 = vmatmul.mubr.msk.f32.vlgmr.msra.gmra.mxu0 %vm822_vm1, %v1170_v24 }
 0x444   : > { %3094 = vmatprep.mubr.msk.f32.mxu0 %vm3418_vm3, %v3417_v10 }
 0x503   : > { %v1251_v27 = vpop.f32.mrf.mxu0 }
 0x504   : > { %v3716_v28 = vadd.f32 %v2836_v26, %v1251_v27 }
 0x505   : > { %v3091_v29 = vpop.f32.mrf.mxu0 }
 0x506   : > { %1425 = vrot.lane.b32.xlu1 %v3716_v28, %s4167_s2  ;;  %1257 = vrot.lane.b32.xlu0 %v3716_v28, %s4169_s27  ;;  %v1255_v30 = vmul.f32 0.25, %v3716_v28  ;;  %s4196_s2 = smov 96  }
 0x50a   : > { %1423 = vrot.lane.b32.xlu1 %v1255_v30, %s4165_s24  ;;  %s4197_s24 = smov 80  }
 0x578   : > { %v1258_v31 = vpop.permute.xlu0 %1257  ;;  %v1426_v32 = vpop.permute.xlu1 %1425 }
 0x579   : > { %3093 = vmatpush3.xpose.msk.msra.mxu0 %vm1259_vm4, %v1258_v31  ;;  %v1710_v31 = vld [vmem:[%s4150_s18 + $0x18] sm:$0xff] }
 0x57a   : > { %3102 = vmatprep.subr.mxu0 %v3417_v10 }
 0x57c   : > { %3095 = vmatmul.mubr.msk.f32.vlgmr.msra.gmra.mxu0 %vm1259_vm4, %v1255_v30  ;;  %v1424_v33 = vpop.permute.xlu1 %1423 }
 0x57d   : > { %3103 = vmatpush3.xpose.msk.msra.mxu0 %vm1259_vm4, %v1426_v32  ;;  %3104 = vmatprep.mubr.msk.f32.mxu0 %vm3418_vm3, %v3417_v10  ;;  %v1708_v32 = vld [vmem:[%s4150_s18 + $0x8] sm:$0xff] }
 0x57e   : > { %3112 = vmatprep.subr.mxu0 %v3417_v10 }
 0x580   : > { %3105 = vmatmul.mubr.msk.f32.vlgmr.msra.gmra.mxu0 %vm1259_vm4, %v1424_v33  ;;  %v1707_v33 = vld [vmem:[%s4150_s18] sm:$0xff] }
 0x581   : > { %3120 = vmatprep.mubr.msk.f32.mxu0 %vm3418_vm3, %v3417_v10  ;;  %3113 = vmatpush3.msra.mxu0 %v1596_v8 }
 0x582   : > { %3114 = vmatprep.subr.mxu0 %v3417_v10 }
 0x583   : > { %3115 = vmatpush3.msra.mxu0 %v1595_v9 }
 0x584   : > { %3116 = vmatprep.subr.mxu0 %v3417_v10 }
 0x585   : > { %3117 = vmatpush3.msra.mxu0 %v1594_v11 }
 0x586   : > { %3118 = vmatprep.subr.mxu0 %v3417_v10 }
 0x587   : > { %3119 = vmatpush3.msra.mxu0 %v1593_v12 }
 0x588   : > { %3134 = vmatprep.subr.mxu0 %v3417_v10 }
 0x63c   : > { %v1331_v44 = vpop.f32.mrf.mxu0 }
 0x63d   : > { %v1332_v45 = vadd.f32 %v1331_v44, %v3741_v43 }
 0x63e   : > { %v3096_v46 = vpop.f32.mrf.mxu0 }
 0x63f   : > { %v1336_v48 = vsel %vm1335_vm9, %v1332_v45, -inf  ;;  %v1814_v46 = vld [vmem:[%s4152_s20 + $0x70] sm:$0xff] }
 0x640   : > { %1337 = vmax.xlane.f32.xlu1 %v1336_v48  ;;  %v1497_v49 = vpop.f32.mrf.mxu0  ;;  %v1813_v48 = vld [vmem:[%s4152_s20 + $0x68] sm:$0xff] }
 0x641   : > { %v1498_v50 = vadd.f32 %v1497_v49, %v3741_v43  ;;  %v1812_v49 = vld [vmem:[%s4152_s20 + $0x60] sm:$0xff] }
 0x642   : > { %v3106_v51 = vpop.f32.mrf.mxu0 }
 0x643   : > { %v1501_v52 = vsel %vm1335_vm9, %v1498_v50, -inf  ;;  %v1810_v51 = vld [vmem:[%s4152_s20 + $0x50] sm:$0xff] }
 0x644   : > { %1502 = vmax.xlane.f32.xlu0 %v1501_v52  ;;  %v1809_v52 = vld [vmem:[%s4152_s20 + $0x48] sm:$0xff] }
 0x651   : > { %1347 = vrot.lane.b32.xlu1 %v3716_v28, %s4166_s5  ;;  %s4198_s5 = smov 64  }
 0x6c9   : > { %v1338_v53 = vpop.xlane.xlu1 %1337 }
 0x6ca   : > { %v1339_v54 = vsub.f32 %v1332_v45, %v1338_v53  ;;  %v1815_v45 = vld [vmem:[%s4152_s20 + $0x78] sm:$0xff]  ;;  %v1808_v53 = vld [vmem:[%s4152_s20 + $0x40] sm:$0xff] }
 0x6cc   : > { %v1340_v55 = vmul.f32 1.442695, %v1339_v54  ;;  %v1807_v54 = vld [vmem:[%s4152_s20 + $0x38] sm:$0xff] }
 0x6cd   : > { %v1348_v56 = vpop.permute.xlu1 %1347  ;;  %v1503_v57 = vpop.xlane.xlu0 %1502 }
 0x6ce   : > { %3318 = vpow2.f32 %v1340_v55  ;;  %v1504_v58 = vsub.f32 %v1498_v50, %v1503_v57  ;;  %3098 = vmatpush3.msra.mxu1 %v1348_v56  ;;  %v1811_v50 = vld [vmem:[%s4152_s20 + $0x58] sm:$0xff]  ;;  %v1806_v55 = vld [vmem:[%s4152_s20 + $0x30] sm:$0xff]  ;;  %v1805_v56 = vld [vmem:[%s4152_s20 + $0x28] sm:$0xff] }
 0x6cf   : > { %3107 = vmatprep.subr.mxu1 %v3417_v10  ;;  %v1804_v57 = vld [vmem:[%s4152_s20 + $0x20] sm:$0xff] }
 0x6d0   : > { %v1505_v59 = vmul.f32 1.442695, %v1504_v58  ;;  %v1803_v58 = vld [vmem:[%s4152_s20 + $0x18] sm:$0xff] }
 0x6d2   : > { %3320 = vpow2.f32 %v1505_v59  ;;  %v1802_v59 = vld [vmem:[%s4152_s20 + $0x10] sm:$0xff] }
 0x6db   : > { %v3319_v60 = vpop.eup %3318 }
 0x6dc   : > { %v1342_v61 = vsel %vm1335_vm9, %v3319_v60, 0.0 }
 0x6dd   : > { %1343 = vadd.xlane.f32.xlu0 %v1342_v61  ;;  %v1800_v61 = vld [vmem:[%s4152_s20] sm:$0xff] }
 0x6df   : > { %v3321_v62 = vpop.eup %3320 }
 0x6e0   : > { %v1507_v0 = vsel %vm1335_vm9, %v3321_v62, 0.0 }
 0x6e1   : > { %1508 = vadd.xlane.f32.xlu0 %v1507_v0 }
 0x6f7   : > { %1512 = vrot.lane.b32.xlu0 %v3716_v28, %s4164_s23  ;;  %s4168_s23 = smov 16  }
 0x766   : > { %v1344_v1 = vpop.xlane.xlu0 %1343 }
 0x767   : > { %3322 = vrcp.f32 %v1344_v1 }
 0x76a   : > { %v1509_v2 = vpop.xlane.xlu0 %1508 }
 0x76b   : > { %3324 = vrcp.f32 %v1509_v2 }
 0x76e   : > { %v1513_v5 = vpop.permute.xlu0 %1512 }
 0x774   : > { %v3323_v3 = vpop.eup %3322 }
 0x775   : > { %v1346_v4 = vmul.f32 %v3323_v3, %v3319_v60  ;;  %v1801_v60 = vld [vmem:[%s4152_s20 + $0x8] sm:$0xff] }
 0x777   : > { %3100 = vmatmul.mubr.msk.f32.vlgmr.msra.gmra.mxu1 %vm1335_vm9, %v1346_v4 }
 0x778   : > { %v3325_v6 = vpop.eup %3324  ;;  %3108 = vmatpush3.msra.mxu1 %v1513_v5  ;;  %3109 = vmatprep.mubr.msk.f32.mxu1 %vm3418_vm3, %v3417_v10 }
 0x779   : > { %v1511_v7 = vmul.f32 %v3325_v6, %v3321_v62  ;;  %3123 = vmatprep.subr.mxu1 %v3417_v10  ;;  %v2848_v62 = vld [vmem:[%s4151_s19] ss:$0 sm:$0xff] }
 0x77b   : > { %3110 = vmatmul.mubr.msk.f32.vlgmr.msra.gmra.mxu1 %vm1335_vm9, %v1511_v7 }
 0x77c   : > { %3131 = vmatprep.mubr.msk.f32.mxu1 %vm3418_vm3, %v3417_v10  ;;  %3124 = vmatpush3.msra.mxu1 %v1710_v31 }
 0x77d   : > { %3125 = vmatprep.subr.mxu1 %v3417_v10 }
 0x837   : > { %v1419_v13 = vpop.f32.mrf.mxu1 }
 0x839   : > { %v3101_v14 = vpop.f32.mrf.mxu1 }
 0x83b   : > { %v1584_v15 = vpop.f32.mrf.mxu1 }
 0x83c   : > { %1589 = vrot.lane.b32.xlu1 %v1584_v15, %s4168_s23  ;;  %s2905_s23 = sshll.u32 %s3564_s4, 4 }
 0x83d   : > { %v3111_v16 = vpop.f32.mrf.mxu1 }
 0x8ae   : > { %v1590_v17 = vpop.permute.xlu1 %1589 }
 0x8af   : > { %v1592_v18 = vsel %vm1259_vm4, %v1419_v13, %v1590_v17  ;;  %v2850_v13 = vld [vmem:[%s4153_s21] ss:$0 sm:$0xff] }
 0x8b0   : > { %3121 = vmatmul.mubr.msk.f32.vlgmr.msra.gmra.mxu0 %vm822_vm1, %v1592_v18 }
 0x8b1   : > { %3166 = vmatprep.mubr.msk.f32.mxu0 %vm3418_vm3, %v3417_v10  ;;  %3135 = vmatpush3.msra.mxu0 %v1815_v45 }
 0x8b2   : > { %3136 = vmatprep.subr.mxu0 %v3417_v10 }
 0x8b3   : > { %3137 = vmatpush3.msra.mxu0 %v1814_v46 }
 0x8b4   : > { %3138 = vmatprep.subr.mxu0 %v3417_v10 }
 0x8b5   : > { %3139 = vmatpush3.msra.mxu0 %v1813_v48 }
 0x8b6   : > { %3140 = vmatprep.subr.mxu0 %v3417_v10 }
 0x8b7   : > { %3141 = vmatpush3.msra.mxu0 %v1812_v49 }
 0x8b8   : > { %3142 = vmatprep.subr.mxu0 %v3417_v10 }
 0x8b9   : > { %3143 = vmatpush3.msra.mxu0 %v1811_v50 }
 0x8ba   : > { %3144 = vmatprep.subr.mxu0 %v3417_v10 }
 0x8bb   : > { %3145 = vmatpush3.msra.mxu0 %v1810_v51 }
 0x8bc   : > { %3146 = vmatprep.subr.mxu0 %v3417_v10 }
 0x8bd   : > { %3147 = vmatpush3.msra.mxu0 %v1809_v52 }
 0x8be   : > { %3148 = vmatprep.subr.mxu0 %v3417_v10 }
 0x8bf   : > { %3149 = vmatpush3.msra.mxu0 %v1808_v53 }
 0x8c0   : > { %3150 = vmatprep.subr.mxu0 %v3417_v10 }
 0x8c1   : > { %3151 = vmatpush3.msra.mxu0 %v1807_v54 }
 0x8c2   : > { %3152 = vmatprep.subr.mxu0 %v3417_v10 }
 0x8c3   : > { %3153 = vmatpush3.msra.mxu0 %v1806_v55 }
 0x8c4   : > { %3154 = vmatprep.subr.mxu0 %v3417_v10 }
 0x8c5   : > { %3155 = vmatpush3.msra.mxu0 %v1805_v56 }
 0x8c6   : > { %3156 = vmatprep.subr.mxu0 %v3417_v10 }
 0x8c7   : > { %3157 = vmatpush3.msra.mxu0 %v1804_v57 }
 0x8c8   : > { %3158 = vmatprep.subr.mxu0 %v3417_v10 }
 0x8c9   : > { %3159 = vmatpush3.msra.mxu0 %v1803_v58 }
 0x8ca   : > { %3160 = vmatprep.subr.mxu0 %v3417_v10 }
 0x8cb   : > { %3161 = vmatpush3.msra.mxu0 %v1802_v59 }
 0x8cc   : > { %3162 = vmatprep.subr.mxu0 %v3417_v10 }
 0x8cd   : > { %3163 = vmatpush3.msra.mxu0 %v1801_v60 }
 0x8ce   : > { %3164 = vmatprep.subr.mxu0 %v3417_v10 }
 0x8cf   : > { %3165 = vmatpush3.msra.mxu0 %v1800_v61 }
 0x8d0   : > { %3211 = vmatprep.subr.mxu0 %v3417_v10 }
 0x970   : > { %v1673_v20 = vpop.f32.mrf.mxu0 }
 0x971   : > { %v1674_v21 = vadd.f32 %v2844_v19, %v1673_v20 }
 0x972   : > { %v3122_v22 = vpop.f32.mrf.mxu0 }
 0x973   : > { %v3786_v23 = vadd.f32 %v1674_v21, %v3670_v63  ;;  %v1709_v63 = vld [vmem:[%s4150_s18 + $0x10] sm:$0xff] }
 0x974   : > { %3126 = vmatpush3.msra.mxu1 %v1709_v63 }
 0x975   : > { %v1680_v24 = vsel %vm822_vm1, %v3786_v23, 0.0  ;;  %3127 = vmatprep.subr.mxu1 %v3417_v10 }
 0x976   : > { %1681 = vadd.xlane.f32.xlu1 %v1680_v24  ;;  %3128 = vmatpush3.msra.mxu1 %v1708_v32  ;;  %v2853_v32 = vld [vmem:[%s4142_s10 + $0x1] ss:$0 sm:$0xff] }
 0x977   : > { %3129 = vmatprep.subr.mxu1 %v3417_v10 }
 0x978   : > { %3130 = vmatpush3.msra.mxu1 %v1707_v33 }
 0x979   : > { %3169 = vmatprep.subr.mxu1 %v3417_v10 }
 0x9ff   : > { %v1682_v26 = vpop.xlane.xlu1 %1681 }
 0xa00   : > { %v1683_v27 = vmul.f32 0.03125, %v1682_v26  ;;  %v2858_v26 = vld [vmem:[%s4144_s12 + $0x38] sm:$0xff] }
 0xa02   : > { %v1684_v28 = vsub.f32 %v3786_v23, %v1683_v27  ;;  %v2856_v27 = vld [vmem:[%s4144_s12 + $0x28] sm:$0xff] }
 0xa04   : > { %v1685_v29 = vmul.f32 %v1684_v28, %v1684_v28 }
 0xa06   : > { %v1686_v30 = vsel %vm822_vm1, %v1685_v29, 0.0 }
 0xa07   : > { %1687 = vadd.xlane.f32.xlu0 %v1686_v30 }
 0xa90   : > { %v1688_v34 = vpop.xlane.xlu0 %1687 }
 0xa91   : > { %v1689_v35 = vmul.f32 0.03125, %v1688_v34  ;;  %v2854_v34 = vld [vmem:[%s4143_s11 + $0x1] ss:$0 sm:$0xff] }
 0xa93   : > { %v1690_v36 = vadd.f32 1e-05, %v1689_v35 }
 0xa95   : > { %3326 = vrsqrt.f32 %v1690_v36 }
 0xaa2   : > { %v3327_v37 = vpop.eup %3326 }
 0xaa3   : > { %v1692_v39 = vmul.f32 %v3327_v37, %v1684_v28  ;;  %v2855_v28 = vld [vmem:[%s4144_s12 + $0x20] sm:$0xff] }
 0xaa4   : > { %v2860_v37 = vld [vmem:[%s4145_s13 + $0x1] ss:$0 sm:$0xff] }
 0xaa5   : > { %v1699_v42 = vmul.f32 %v2846_v38, %v1692_v39 }
 0xaa7   : > { %v1706_v44 = vadd.f32 %v2847_v41, %v1699_v42 }
 0xaa9   : > { %3132 = vmatmul.mubr.msk.f32.vlgmr.msra.gmra.mxu1 %vm822_vm1, %v1706_v44 }
 0xaaa   : > { %3177 = vmatprep.mubr.msk.f32.mxu1 %vm3418_vm3, %v3417_v10  ;;  %3170 = vmatpush3.msra.mxu1 %v2858_v26 }
 0xaab   : > { %3171 = vmatprep.subr.mxu1 %v3417_v10 }
 0xb69   : > { %v1787_v0 = vpop.f32.mrf.mxu1 }
 0xb6a   : > { %v1788_v1 = vadd.f32 %v2848_v62, %v1787_v0 }
 0xb6b   : > { %v3133_v2 = vpop.f32.mrf.mxu1 }
 0xb6c   : > { %v1792_v3 = vmul.f32 0.044715, %v1788_v1  ;;  %v1791_v9 = vmul.f32 0.5, %v1788_v1 }
 0xb6e   : > { %v1793_v4 = vmul.f32 %v1792_v3, %v1788_v1 }
 0xb70   : > { %v1794_v5 = vmul.f32 %v1793_v4, %v1788_v1 }
 0xb72   : > { %v1795_v6 = vadd.f32 %v1794_v5, %v1788_v1 }
 0xb74   : > { %v1796_v7 = vmul.f32 0.7978846, %v1795_v6 }
 0xb76   : > { %3328 = vtanh.f32 %v1796_v7 }
 0xb83   : > { %v3329_v8 = vpop.eup %3328 }
 0xb84   : > { %v1798_v11 = vadd.f32 1.0, %v3329_v8 }
 0xb86   : > { %v1799_v12 = vmul.f32 %v1798_v11, %v1791_v9 }
 0xb88   : > { %3167 = vmatmul.mubr.f32.vlgmr.msra.gmra.mxu0 %v1799_v12 }
 0xb89   : > { %3219 = vmatprep.mubr.msk.f32.mxu0 %vm3418_vm3, %v3417_v10 }
 0xc48   : > { %v1889_v14 = vpop.f32.mrf.mxu0 }
 0xc49   : > { %v1890_v15 = vadd.f32 %v2850_v13, %v1889_v14  ;;  %v2871_v13 = vld [vmem:[%s4146_s14 + $0x38] sm:$0xff]  ;;  %v2870_v14 = vld [vmem:[%s4146_s14 + $0x30] sm:$0xff] }
 0xc4a   : > { %v3168_v16 = vpop.f32.mrf.mxu0 }
 0xc4b   : > { %v3890_v17 = vadd.f32 %v1890_v15, %v3786_v23  ;;  %v2857_v23 = vld [vmem:[%s4144_s12 + $0x30] sm:$0xff]  ;;  %v2869_v15 = vld [vmem:[%s4146_s14 + $0x28] sm:$0xff]  ;;  %v2868_v16 = vld [vmem:[%s4146_s14 + $0x20] sm:$0xff] }
 0xc4c   : > { %3172 = vmatpush3.msra.mxu1 %v2857_v23 }
 0xc4d   : > { %v1898_v18 = vsel %vm822_vm1, %v3890_v17, 0.0  ;;  %3173 = vmatprep.subr.mxu1 %v3417_v10 }
 0xc4e   : > { %1899 = vadd.xlane.f32.xlu0 %v1898_v18  ;;  %3174 = vmatpush3.msra.mxu1 %v2856_v27 }
 0xc4f   : > { %3175 = vmatprep.subr.mxu1 %v3417_v10 }
 0xc50   : > { %3176 = vmatpush3.msra.mxu1 %v2855_v28 }
 0xc51   : > { %3180 = vmatprep.subr.mxu1 %v3417_v10 }
 0xcd7   : > { %v1900_v19 = vpop.xlane.xlu0 %1899 }
 0xcd8   : > { %v1901_v20 = vmul.f32 0.03125, %v1900_v19 }
 0xcda   : > { %v1902_v21 = vsub.f32 %v3890_v17, %v1901_v20 }
 0xcdc   : > { %v1903_v22 = vmul.f32 %v1902_v21, %v1902_v21 }
 0xcde   : > { %v1904_v24 = vsel %vm822_vm1, %v1903_v22, 0.0  ;;  %v2873_v22 = vld [vmem:[%s4147_s15 + $0x1] ss:$0 sm:$0xff] }
 0xcdf   : > { %1905 = vadd.xlane.f32.xlu1 %v1904_v24 }
 0xd68   : > { %v1906_v29 = vpop.xlane.xlu1 %1905 }
 0xd69   : > { %v1907_v30 = vmul.f32 0.03125, %v1906_v29 }
 0xd6b   : > { %v1908_v31 = vadd.f32 1e-05, %v1907_v30 }
 0xd6d   : > { %3330 = vrsqrt.f32 %v1908_v31 }
 0xd7a   : > { %v3331_v63 = vpop.eup %3330 }
 0xd7b   : > { %v1910_v33 = vmul.f32 %v3331_v63, %v1902_v21 }
 0xd7d   : > { %v1917_v35 = vmul.f32 %v2853_v32, %v1910_v33  ;;  %v2882_v33 = vld [vmem:[%s4150_s18 + $0x38] sm:$0xff] }
 0xd7e   : > { %3212 = vmatpush3.msra.mxu0 %v2882_v33 }
 0xd7f   : > { %v1924_v36 = vadd.f32 %v2854_v34, %v1917_v35  ;;  %3213 = vmatprep.subr.mxu0 %v3417_v10  ;;  %v2880_v34 = vld [vmem:[%s4150_s18 + $0x28] sm:$0xff]  ;;  %v2879_v35 = vld [vmem:[%s4150_s18 + $0x20] sm:$0xff] }
 0xd81   : > { %3178 = vmatmul.mubr.msk.f32.vlgmr.msra.gmra.mxu1 %vm822_vm1, %v1924_v36 }
 0xd82   : > { %3182 = vmatprep.mubr.msk.f32.mxu1 %vm3418_vm3, %v3417_v10 }
 0xe41   : > { %v2007_v38 = vpop.f32.mrf.mxu1 }
 0xe42   : > { %v2008_v39 = vadd.f32 %v2860_v37, %v2007_v38 }
 0xe43   : > { %v3179_v41 = vpop.f32.mrf.mxu1 }
 0xe44   : > { %2013 = vrot.lane.b32.xlu0 %v2008_v39, %s4196_s2  ;;  %v2011_v44 = vmul.f32 0.25, %v2008_v39  ;;  %v2877_v41 = vld [vmem:[%s4148_s16 + $0x1] ss:$0 sm:$0xff] }
 0xe48   : > { %2179 = vrot.lane.b32.xlu0 %v2008_v39, %s4197_s24 }
 0xeb6   : > { %v2014_v42 = vpop.permute.xlu0 %2013 }
 0xeb7   : > { %3181 = vmatpush3.xpose.msk.msra.mxu1 %vm1259_vm4, %v2014_v42 }
 0xeb8   : > { %3185 = vmatprep.subr.mxu1 %v3417_v10 }
 0xeba   : > { %3183 = vmatmul.mubr.msk.f32.vlgmr.msra.gmra.mxu1 %vm1259_vm4, %v2011_v44  ;;  %v2180_v59 = vpop.permute.xlu0 %2179 }
 0xebb   : > { %3187 = vmatprep.mubr.msk.f32.mxu1 %vm3418_vm3, %v3417_v10 }
 0xf7a   : > { %v2086_v45 = vpop.f32.mrf.mxu1 }
 0xf7b   : > { %v2087_v46 = vadd.f32 %v2086_v45, %v3741_v43 }
 0xf7c   : > { %v3184_v48 = vpop.f32.mrf.mxu1 }
 0xf7d   : > { %v2090_v49 = vsel %vm1335_vm9, %v2087_v46, -inf  ;;  %v2901_v48 = vld [vmem:[%s4152_s20 + $0xf8] sm:$0xff] }
 0xf7e   : > { %2091 = vmax.xlane.f32.xlu1 %v2090_v49  ;;  %v2900_v49 = vld [vmem:[%s4152_s20 + $0xf0] sm:$0xff] }
 0xf8f   : > { %2101 = vrot.lane.b32.xlu1 %v2008_v39, %s4198_s5  ;;  %s2819_s5 = sshll.u32 %s3602_s29, 3  ;;  %s698_s29 = sand.u32 1, %s3407_s28  }
 0xf90   : > { %s699_s24 = scalar_lea.vmem [#allocation2], %s698_s29  ;;  %s2725_s4 = scalar_lea.sflag [#allocation3], %s698_s29 }
0x1007   : > { %v2092_v50 = vpop.xlane.xlu1 %2091 }
0x1008   : > { %v2093_v51 = vsub.f32 %v2087_v46, %v2092_v50  ;;  %v2899_v50 = vld [vmem:[%s4152_s20 + $0xe8] sm:$0xff] }
0x100a   : > { %v2094_v52 = vmul.f32 1.442695, %v2093_v51  ;;  %v2898_v51 = vld [vmem:[%s4152_s20 + $0xe0] sm:$0xff] }
0x100b   : > { %v2102_v53 = vpop.permute.xlu1 %2101 }
0x100c   : > { %3332 = vpow2.f32 %v2094_v52  ;;  %3186 = vmatpush3.msra.mxu1 %v2102_v53  ;;  %v2897_v52 = vld [vmem:[%s4152_s20 + $0xd8] sm:$0xff]  ;;  %v2896_v53 = vld [vmem:[%s4152_s20 + $0xd0] sm:$0xff] }
0x100d   : > { %3190 = vmatprep.subr.mxu1 %v3417_v10 }
0x1019   : > { %v3333_v54 = vpop.eup %3332 }
0x101a   : > { %v2096_v55 = vsel %vm1335_vm9, %v3333_v54, 0.0 }
0x101b   : > { %2097 = vadd.xlane.f32.xlu1 %v2096_v55  ;;  %v2894_v55 = vld [vmem:[%s4152_s20 + $0xc0] sm:$0xff] }
0x102c   : > { %2177 = vrot.lane.b32.xlu1 %v2011_v44, %s4199_s0  ;;  %v2878_v44 = vld [vmem:[%s4149_s17 + $0x1] ss:$0 sm:$0xff] }
0x10a4   : > { %v2098_v56 = vpop.xlane.xlu1 %2097 }
0x10a5   : > { %3334 = vrcp.f32 %v2098_v56  ;;  %v2893_v56 = vld [vmem:[%s4152_s20 + $0xb8] sm:$0xff] }
0x10a8   : > { %v2178_v60 = vpop.permute.xlu1 %2177 }
0x10b2   : > { %v3335_v57 = vpop.eup %3334 }
0x10b3   : > { %v2100_v58 = vmul.f32 %v3335_v57, %v3333_v54  ;;  %v2895_v54 = vld [vmem:[%s4152_s20 + $0xc8] sm:$0xff]  ;;  %v2892_v57 = vld [vmem:[%s4152_s20 + $0xb0] sm:$0xff] }
0x10b5   : > { %3188 = vmatmul.mubr.msk.f32.vlgmr.msra.gmra.mxu1 %vm1335_vm9, %v2100_v58  ;;  %v2891_v58 = vld [vmem:[%s4152_s20 + $0xa8] sm:$0xff] }
0x10b6   : > { %3191 = vmatpush3.xpose.msk.msra.mxu1 %vm1259_vm4, %v2180_v59  ;;  %3192 = vmatprep.mubr.msk.f32.mxu1 %vm3418_vm3, %v3417_v10  ;;  %v2890_v59 = vld [vmem:[%s4152_s20 + $0xa0] sm:$0xff] }
0x10b7   : > { %3195 = vmatprep.subr.mxu1 %v3417_v10 }
0x10b9   : > { %3193 = vmatmul.mubr.msk.f32.vlgmr.msra.gmra.mxu1 %vm1259_vm4, %v2178_v60  ;;  %v2889_v60 = vld [vmem:[%s4152_s20 + $0x98] sm:$0xff] }
0x10ba   : > { %3197 = vmatprep.mubr.msk.f32.mxu1 %vm3418_vm3, %v3417_v10 }
0x1175   : > { %v2173_v61 = vpop.f32.mrf.mxu1 }
0x1177   : > { %v3189_v62 = vpop.f32.mrf.mxu1 }
0x1178   : > { %v2887_v62 = vld [vmem:[%s4152_s20 + $0x88] sm:$0xff] }
0x1179   : > { %v2251_v0 = vpop.f32.mrf.mxu1 }
0x117a   : > { %v2252_v1 = vadd.f32 %v2251_v0, %v3741_v43  ;;  %v2886_v0 = vld [vmem:[%s4152_s20 + $0x80] sm:$0xff] }
0x117b   : > { %v3194_v2 = vpop.f32.mrf.mxu1 }
0x117c   : > { %v2255_v3 = vsel %vm1335_vm9, %v2252_v1, -inf }
0x117d   : > { %2256 = vmax.xlane.f32.xlu0 %v2255_v3 }
0x1193   : > { %2266 = vrot.lane.b32.xlu0 %v2008_v39, %s4200_s1 }
0x1206   : > { %v2257_v4 = vpop.xlane.xlu0 %2256 }
0x1207   : > { %v2258_v5 = vsub.f32 %v2252_v1, %v2257_v4  ;;  %v2884_v1 = vld [vmem:[%s4151_s19 + $0x1] ss:$0 sm:$0xff] }
0x1209   : > { %v2259_v6 = vmul.f32 1.442695, %v2258_v5 }
0x120a   : > { %v2267_v7 = vpop.permute.xlu0 %2266 }
0x120b   : > { %3336 = vpow2.f32 %v2259_v6  ;;  %3196 = vmatpush3.msra.mxu1 %v2267_v7 }
0x120c   : > { %3200 = vmatprep.subr.mxu1 %v3417_v10 }
0x1218   : > { %v3337_v8 = vpop.eup %3336 }
0x1219   : > { %v2261_v9 = vsel %vm1335_vm9, %v3337_v8, 0.0 }
0x121a   : > { %2262 = vadd.xlane.f32.xlu1 %v2261_v9 }
0x12a3   : > { %v2263_v11 = vpop.xlane.xlu1 %2262 }
0x12a4   : > { %3338 = vrcp.f32 %v2263_v11 }
0x12b1   : > { %v3339_v43 = vpop.eup %3338 }
0x12b2   : > { %v2265_v12 = vmul.f32 %v3339_v43, %v3337_v8 }
0x12b4   : > { %3198 = vmatmul.mubr.msk.f32.vlgmr.msra.gmra.mxu1 %vm1335_vm9, %v2265_v12 }
0x12b5   : > { %3208 = vmatprep.mubr.msk.f32.mxu1 %vm3418_vm3, %v3417_v10  ;;  %3201 = vmatpush3.msra.mxu1 %v2871_v13 }
0x12b6   : > { %3202 = vmatprep.subr.mxu1 %v3417_v10 }
0x12b7   : > { %3203 = vmatpush3.msra.mxu1 %v2870_v14  ;;  %v3354_v14 = vld [vmem:[%s4191_s25] ss:$0 sm:$0xff] }
0x12b8   : > { %3204 = vmatprep.subr.mxu1 %v3417_v10 }
0x12b9   : > { %3205 = vmatpush3.msra.mxu1 %v2869_v15  ;;  %v1079_v15 = vadd.f32 %v3354_v14, %v3711_v25 }
0x12ba   : > { %3206 = vmatprep.subr.mxu1 %v3417_v10 }
0x12bb   : > { %3207 = vmatpush3.msra.mxu1 %v2868_v16  ;;  %v1087_v16 = vmul.f32 0.044715, %v1079_v15 }
0x12bc   : > { %3222 = vmatprep.subr.mxu1 %v3417_v10 }
0x1374   : > { %v2338_v18 = vpop.f32.mrf.mxu1 }
0x1375   : > { %2343 = vrot.lane.b32.xlu1 %v2338_v18, %s4201_s3  ;;  %v1088_v18 = vmul.f32 %v1087_v16, %v1079_v15  ;;  %s4202_s3 = sld [smem:[#allocation12_spill]] }
0x1376   : > { %v3199_v19 = vpop.f32.mrf.mxu1 }
0x1377   : > { %v1089_v19 = vmul.f32 %v1088_v18, %v1079_v15 }
0x137b   : > { %s711_s27 = scalar_lea.vmem %s4202_s3, %s2819_s5  ;;  %s2737_s5 = sshll.u32 %s699_s24, 4  ;;  %s2738_s5 = int_to_ptr.vmem [resolvable:$true] %s2737_s5 }
0x137c   : > { %s3355_s7 = scalar_lea.vmem %s2738_s5, 16 }
0x137d   : > { %p3356_p11 = scmp.ne.s32.totalorder %s2738_s5, %s3355_s7 }
0x137f   : > { %p3357_p12 = pnand %p3356_p11, %p3581_p5 }
0x1381   : > { %p3358_p13 = pneg %p3357_p12 }
0x13e7   : > { %v2344_v20 = vpop.permute.xlu1 %2343 }
0x13e8   : > { %v2346_v21 = vsel %vm1259_vm4, %v2173_v61, %v2344_v20  ;;  %v2888_v61 = vld [vmem:[%s4152_s20 + $0x90] sm:$0xff]  ;;  %v1090_v20 = vadd.f32 %v1089_v19, %v1079_v15 }
0x13e9   : > { %3209 = vmatmul.mubr.msk.f32.vlgmr.msra.gmra.mxu1 %vm822_vm1, %v2346_v21 }
0x13ea   : > { %3254 = vmatprep.mubr.msk.f32.mxu1 %vm3418_vm3, %v3417_v10  ;;  %3223 = vmatpush3.msra.mxu1 %v2901_v48  ;;  %v1091_v21 = vmul.f32 0.7978846, %v1090_v20 }
0x13eb   : > { %3224 = vmatprep.subr.mxu1 %v3417_v10 }
0x13ec   : > { %3225 = vmatpush3.msra.mxu1 %v2900_v49 }
0x13ed   : > { %3226 = vmatprep.subr.mxu1 %v3417_v10 }
0x13ee   : > { %3227 = vmatpush3.msra.mxu1 %v2899_v50 }
0x13ef   : > { %3228 = vmatprep.subr.mxu1 %v3417_v10 }
0x13f0   : > { %3229 = vmatpush3.msra.mxu1 %v2898_v51 }
0x13f1   : > { %3230 = vmatprep.subr.mxu1 %v3417_v10 }
0x13f2   : > { %3231 = vmatpush3.msra.mxu1 %v2897_v52 }
0x13f3   : > { %3232 = vmatprep.subr.mxu1 %v3417_v10 }
0x13f4   : > { %3233 = vmatpush3.msra.mxu1 %v2896_v53 }
0x13f5   : > { %3234 = vmatprep.subr.mxu1 %v3417_v10 }
0x13f6   : > { %3235 = vmatpush3.msra.mxu1 %v2895_v54 }
0x13f7   : > { %3236 = vmatprep.subr.mxu1 %v3417_v10 }
0x13f8   : > { %3237 = vmatpush3.msra.mxu1 %v2894_v55 }
0x13f9   : > { %3238 = vmatprep.subr.mxu1 %v3417_v10 }
0x13fa   : > { %3239 = vmatpush3.msra.mxu1 %v2893_v56 }
0x13fb   : > { %3240 = vmatprep.subr.mxu1 %v3417_v10 }
0x13fc   : > { %3241 = vmatpush3.msra.mxu1 %v2892_v57 }
0x13fd   : > { %3242 = vmatprep.subr.mxu1 %v3417_v10 }
0x13fe   : > { %3243 = vmatpush3.msra.mxu1 %v2891_v58 }
0x13ff   : > { %3244 = vmatprep.subr.mxu1 %v3417_v10 }
0x1400   : > { %3245 = vmatpush3.msra.mxu1 %v2890_v59 }
0x1401   : > { %3246 = vmatprep.subr.mxu1 %v3417_v10 }
0x1402   : > { %3247 = vmatpush3.msra.mxu1 %v2889_v60 }
0x1403   : > { %3248 = vmatprep.subr.mxu1 %v3417_v10 }
0x1404   : > { %3249 = vmatpush3.msra.mxu1 %v2888_v61 }
0x1405   : > { %3250 = vmatprep.subr.mxu1 %v3417_v10 }
0x1406   : > { %3251 = vmatpush3.msra.mxu1 %v2887_v62 }
0x1407   : > { %3252 = vmatprep.subr.mxu1 %v3417_v10 }
0x1408   : > { %3253 = vmatpush3.msra.mxu1 %v2886_v0 }
0x14a9   : > { %v2429_v24 = vpop.f32.mrf.mxu1 }
0x14aa   : > { %v2430_v26 = vadd.f32 %v2873_v22, %v2429_v24  ;;  %v2903_v24 = vld [vmem:[%s4153_s21 + $0x1] ss:$0 sm:$0xff] }
0x14ab   : > { %v3210_v23 = vpop.f32.mrf.mxu1 }
0x14ac   : > { %v3978_v27 = vadd.f32 %v2430_v26, %v3890_v17  ;;  %v2881_v17 = vld [vmem:[%s4150_s18 + $0x30] sm:$0xff] }
0x14ad   : > { %3214 = vmatpush3.msra.mxu0 %v2881_v17 }
0x14ae   : > { %v2438_v28 = vsel %vm822_vm1, %v3978_v27, 0.0  ;;  %3215 = vmatprep.subr.mxu0 %v3417_v10 }
0x14af   : > { %2439 = vadd.xlane.f32.xlu0 %v2438_v28  ;;  %3216 = vmatpush3.msra.mxu0 %v2880_v34  ;;  %v1086_v28 = vmul.f32 0.5, %v1079_v15  ;;  %v2671_v34 = vld [vmem:[%s711_s27] sm:$0xff]  ;;  %s4097_s27 = scalar_lea.hbm %s4154_s22, %s2905_s23 }
0x14b0   : > { %3217 = vmatprep.subr.mxu0 %v3417_v10  ;;  %vm2672_vm10 = vcmp.ne.f32.partialorder %v2671_v34, 0.0 }
0x14b1   : > { %3218 = vmatpush3.msra.mxu0 %v2879_v35  ;;  %v2904_v35 = vsel %vm2672_vm10, 1.0, %v3417_v10 }
0x1538   : > { %v2440_v29 = vpop.xlane.xlu0 %2439 }
0x1539   : > { %v2441_v30 = vmul.f32 0.03125, %v2440_v29 }
0x153b   : > { %v2442_v31 = vsub.f32 %v3978_v27, %v2441_v30 }
0x153d   : > { %v2443_v63 = vmul.f32 %v2442_v31, %v2442_v31 }
0x153f   : > { %v2444_v32 = vsel %vm822_vm1, %v2443_v63, 0.0 }
0x1540   : > { %2445 = vadd.xlane.f32.xlu1 %v2444_v32 }
0x15c9   : > { %v2446_v36 = vpop.xlane.xlu1 %2445 }
0x15ca   : > { %v2447_v37 = vmul.f32 0.03125, %v2446_v36 }
0x15cc   : > { %v2448_v38 = vadd.f32 1e-05, %v2447_v37 }
0x15ce   : > { %3340 = vrsqrt.f32 %v2448_v38 }
0x15db   : > { %v3341_v39 = vpop.eup %3340 }
0x15dc   : > { %v2450_v42 = vmul.f32 %v3341_v39, %v2442_v31 }
0x15de   : > { %v2457_v45 = vmul.f32 %v2877_v41, %v2450_v42 }
0x15e0   : > { %v2464_v46 = vadd.f32 %v2878_v44, %v2457_v45 }
0x15e2   : > { %3220 = vmatmul.mubr.msk.f32.vlgmr.msra.gmra.mxu0 %vm822_vm1, %v2464_v46 }
0x16a2   : > { %v2547_v2 = vpop.f32.mrf.mxu0 }
0x16a3   : > { %v2548_v3 = vadd.f32 %v2884_v1, %v2547_v2 }
0x16a4   : > { %v3221_v4 = vpop.f32.mrf.mxu0 }
0x16a5   : > { %v2552_v5 = vmul.f32 0.044715, %v2548_v3  ;;  %v2551_v43 = vmul.f32 0.5, %v2548_v3 }
0x16a7   : > { %v2553_v6 = vmul.f32 %v2552_v5, %v2548_v3 }
0x16a9   : > { %v2554_v7 = vmul.f32 %v2553_v6, %v2548_v3 }
0x16ab   : > { %v2555_v8 = vadd.f32 %v2554_v7, %v2548_v3 }
0x16ad   : > { %v2556_v9 = vmul.f32 0.7978846, %v2555_v8 }
0x16af   : > { %3342 = vtanh.f32 %v2556_v9 }
0x16b0   : > { %3344 = vtanh.f32 %v1091_v21 }
0x16bc   : > { %v3343_v11 = vpop.eup %3342 }
0x16bd   : > { %v2558_v12 = vadd.f32 1.0, %v3343_v11  ;;  %v3345_v22 = vpop.eup %3344 }
0x16be   : > { %v1093_v29 = vadd.f32 1.0, %v3345_v22 }
0x16bf   : > { %v2559_v13 = vmul.f32 %v2558_v12, %v2551_v43 }
0x16c0   : > { %v1094_v63 = vmul.f32 %v1093_v29, %v1086_v28 }
0x16c1   : > { %3255 = vmatmul.mubr.f32.vlgmr.msra.gmra.mxu1 %v2559_v13 }
0x1781   : > { %v2651_v26 = vpop.f32.mrf.mxu1 }
0x1782   : > { %v2652_v23 = vadd.f32 %v2903_v24, %v2651_v26 }
0x1783   : > { %v3256_v30 = vpop.f32.mrf.mxu1 }
0x1784   : > { %v2655_v31 = vadd.f32 %v2652_v23, %v3978_v27 }
0x1786   : > { %v2663_v25 = vmul.f32 %v3657_v47, %v2655_v31  ;;  %v2667_v33 = vmul.f32 %v2655_v31, %v1094_v63  ;;  %v2707_v47 = vsel %vm2696_vm11, %v2904_v35, 0.0 }
0x1787   : > { %2708 = vadd.xlane.f32.xlu1 %v2707_v47 }
0x1788   : > { %v2664_v32 = vsel %vm822_vm1, %v2663_v25, 0.0  ;;  %v2668_v17 = vsel %vm822_vm1, %v2667_v33, 0.0 }
0x1789   : > { %2665 = vadd.xlane.f32.xlu0 %v2664_v32 }
0x178d   : > { %2669 = vadd.xlane.f32.xlu0 %v2668_v17 }
0x1810   : > { %v2709_v61 = vpop.xlane.xlu1 %2708 }
0x1811   : > { %v2710_v62 = vrot.slane %v2709_v61, 4 }
0x1812   : > { %v2666_v27 = vpop.xlane.xlu0 %2665 }
0x1813   : > { %v2675_v36 = vsub.f32 0.0, %v2666_v27  ;;  %v2711_v0 = vadd.f32 %v2710_v62, %v2709_v61 }
0x1815   : > { %v2677_v37 = vand.u32 2147483647, %v2675_v36  ;;  %v2676_v53 = vmax.f32 %v2675_v36, 0.0  ;;  %v2712_v1 = vrot.slane %v2711_v0, 2 }
0x1816   : > { %v2670_v38 = vpop.xlane.xlu0 %2669 }
0x1817   : > { %v2678_v39 = vsub.f32 0.0, %v2677_v37  ;;  %v2686_v41 = vand.u32 2147483647, %v2670_v38  ;;  %v2685_v54 = vmax.f32 %v2670_v38, 0.0  ;;  %v2713_v5 = vadd.f32 %v2712_v1, %v2711_v0 }
0x1819   : > { %v2679_v42 = vmul.f32 1.442695, %v2678_v39  ;;  %v2687_v44 = vsub.f32 0.0, %v2686_v41  ;;  %v2714_v8 = vrot.slane %v2713_v5, 1 }
0x181b   : > { %3346 = vpow2.f32 %v2679_v42  ;;  %v2688_v45 = vmul.f32 1.442695, %v2687_v44  ;;  %v2715_v43 = vadd.f32 %v2714_v8, %v2713_v5 }
0x181d   : > { %3348 = vpow2.f32 %v2688_v45 }
0x1828   : > { %v3347_v46 = vpop.eup %3346 }
0x1829   : > { %v2681_v48 = vadd.f32 1.0, %v3347_v46 }
0x182a   : > { %v3349_v49 = vpop.eup %3348 }
0x182b   : > { %3350 = vlog2.f32 %v2681_v48  ;;  %v2690_v10 = vadd.f32 1.0, %v3349_v49 }
0x182d   : > { %3352 = vlog2.f32 %v2690_v10 }
0x1838   : > { %v3351_v50 = vpop.eup %3350 }
0x1839   : > { %v2683_v51 = vmul.f32 0.6931472, %v3351_v50 }
0x183a   : > { %v3353_v52 = vpop.eup %3352 }
0x183b   : > { %v2692_v55 = vmul.f32 0.6931472, %v3353_v52  ;;  %v2684_v56 = vadd.f32 %v2683_v51, %v2676_v53 }
0x183d   : > { %v2693_v57 = vadd.f32 %v2692_v55, %v2685_v54 }
0x183f   : > { %v2694_v58 = vadd.f32 %v2693_v57, %v2684_v56 }
0x1841   : > { %v2695_v59 = vmul.f32 %v2904_v35, %v2694_v58 }
0x1843   : > { %v2697_v60 = vsel %vm2696_vm11, %v2695_v59, 0.0 }
0x1844   : > { %2698 = vadd.xlane.f32.xlu0 %v2697_v60 }
0x18cd   : > { %v2699_v2 = vpop.xlane.xlu0 %2698 }
0x18ce   : > { %v2700_v3 = vrot.slane %v2699_v2, 4 }
0x18d0   : > { %v2701_v4 = vadd.f32 %v2700_v3, %v2699_v2 }
0x18d2   : > { %v2702_v6 = vrot.slane %v2701_v4, 2 }
0x18d4   : > { %v2703_v7 = vadd.f32 %v2702_v6, %v2701_v4 }
0x18d6   : > { %v2704_v9 = vrot.slane %v2703_v7, 1 }
0x18d8   : > { %v2705_v11 = vadd.f32 %v2704_v9, %v2703_v7 }
0x18da   : > { %3257 = vpush %v2705_v11 }
0x18db   : > { %3259 = vpush %v2715_v43 }
0x190b   : > { %s3258_s2 = spop %3257 }
0x190c   : > { %v2721_v12 = vstv %s3258_s2  ;;  %s3260_s0 = spop %3259  ;;  %s3427_s2 = smov [#allocation2]  }
0x190d   : > { %v2719_v13 = vstv %s3260_s0  ;;  %s3359_s8 = sshll.u32 %s3427_s2, 4  ;;  %s3360_s8 = int_to_ptr.vmem [resolvable:$false] %s3359_s8 }
0x190e   : > { %v2720_v14 = vsel %vm2718_vm12, %v2719_v13, 0.0  ;;  %s3361_s9 = scalar_lea.vmem %s3360_s8, 32  ;;  %p3362_p0 = scmp.lt.s32.totalorder %s2738_s5, %s3360_s8 }
0x190f   : > { %v2722_v15 = vsel %vm2717_vm13, %v2721_v12, %v2720_v14  ;;  %p3363_p1 = scmp.lt.s32.totalorder %s3361_s9, %s3355_s7 }
0x1910   : > { %2723 = vst [vmem:[%s699_s24] sm:$0x1] %v2722_v15 }
0x1911   : > { %p3364_p2 = por %p3363_p1, %p3362_p0 }
0x1913   : > { %p3365_p3 = pnand %p3364_p2, %p3358_p13 }
0x1915   : > { %3368 = shalt.err (!%p3365_p3)
}
0x1916   : > { %s3369_s23 = scalar_lea.hbm %s4097_s27, 16  ;;  %s3373_s0 = scalar_lea.hbm %s4154_s22, 32 }
0x1917   : > { %p3370_p4 = scmp.ne.s32.totalorder %s4097_s27, %s3369_s23  ;;  %p3374_p9 = scmp.lt.s32.totalorder %s4097_s27, %s4154_s22 }
0x1918   : > { %p3375_p10 = scmp.lt.s32.totalorder %s3373_s0, %s3369_s23 }
0x1919   : > { %p3371_p7 = pnand %p3370_p4, %p3581_p5 }
0x191a   : > { %p3376_p11 = por %p3375_p10, %p3374_p9 }
0x191b   : > { %p3372_p8 = pneg %p3371_p7 }
0x191d   : > { %p3377_p12 = pnand %p3376_p11, %p3372_p8 }
0x191f   : > { %3380 = shalt.err (!%p3377_p12)
}
0x1920   : > { %3261 = dma.vmem_to_hbm [thread:$0]  (%p3581_p5), %s2738_s5, 16, %s4097_s27, %s2725_s4  }
0x1921 PF: > { %s4203_s7 = sld [smem:[#allocation5_spill]]  ;;  %p3267_p13 = scmp.ge.s32.totalorder %s3415_s30, 2 }
0x1923   : > { %p3264_p0 = pnand %p3267_p13, %p3585_p6 }
0x1925   : > { %p3265_p1 = pneg %p3264_p0 }
0x1927   : > { %s2749_s9 = sand.u32 1, %s4203_s7  }
0x1928   : > { %s2750_s2 = scalar_lea.sflag [#allocation3], %s2749_s9 }
0x1929   : > { %3398 = dma.done.wait (%p3265_p1), %s2750_s2, 16  }
0x192a   : > { %3400 = vsyncadd (%p3265_p1), %s2750_s2, 4294967280  ;;  %s4205_s30 = sld [smem:[#allocation7_spill]]  ;;  %s4208_s3 = smov %s3407_s28 }
0x192b   : > { %s4206_s23 = sld [smem:[#allocation6_spill]] }
0x192c   : > { %s4207_s29 = sld [smem:[#allocation8_spill]] }
0x1930   : > { %p32_p2 = scmp.ge.s32.totalorder %s4205_s30, 4  }
0x1931   : > { %s4209_s28 = smov %s4206_s23 }
0x1932   :  { %34 = sbr.rel (!%p32_p2) target bundleno = 14 (0xe), region = 162 }
0x1937   :  { %2754 = vsyncpa [#allocation3], 1 }
0x1938   :  { %2756 = vsyncpa [#allocation3 + $0x1], 1 }

</bundles_post_ra>
